<compile_context>
chip_gen: v7x
topology: tpu7x:2x2x1
jax: 0.10.0
libtpu: 0.0.40
codegen_flags: <defaults>
</compile_context>

<pallas_src>
import jax
import jax.numpy as jnp
from jax import lax
from jax.experimental import pallas as pl
from jax.experimental.pallas import tpu as pltpu


def _ffn_kernel(x_ref, w_in_ref, b_in_ref, w_dw_ref, b_dw_ref,
                w_out_ref, b_out_ref, o_ref, y_pad_ref):
    # Per grid step (n, t):
    #   x_ref:     (1, H+2, W, C)      whole zero-row-padded image (resident across t)
    #   w_in_ref:  (2, C, E)           project_in weight, pre-split chunk halves
    #   b_in_ref:  (2, 1, E)           f32
    #   w_dw_ref:  (2, 3, 3, E)        depthwise 3x3 weight, pre-split halves
    #   b_dw_ref:  (2, 1, E)           f32
    #   w_out_ref: (E, C)
    #   b_out_ref: (1, C)              f32
    #   o_ref:     (1, TH, W, C)       output rows [t*TH, t*TH+TH)
    #   y_pad_ref: (2, TH+2, W+16, E)  scratch (compute dtype); interior cols [8, 8+W)
    TH, W, C = o_ref.shape[1], o_ref.shape[2], o_ref.shape[3]
    E = w_in_ref.shape[2]
    cdt = w_in_ref.dtype                      # compute dtype (f32 or bf16)
    rows = TH + 2

    t = pl.program_id(1)
    n_t = pl.num_programs(1)

    # ---- W-halo: zero the two 8-wide (sublane-aligned) bands every step ----
    # Cheap (16/(W+16) of a store pass) and robust under megacore sharding of
    # the parallel grid (no reliance on "first grid step" scratch init).
    y_pad_ref[:, :, 0:8, :] = jnp.zeros((2, rows, 8, E), cdt)
    y_pad_ref[:, :, 8 + W:16 + W, :] = jnp.zeros((2, rows, 8, E), cdt)

    # ---- project_in: 1x1 conv == one full-K MXU matmul per chunk half ------
    # Recompute the 2 halo rows from the resident (row-padded) input.
    r0 = pl.multiple_of(t * TH, TH)
    xs = x_ref[0, pl.ds(r0, rows), :, :]                    # (TH+2, W, C)
    x2d = xs.reshape(rows * W, C).astype(cdt)
    for half in (0, 1):                                     # static unroll
        y = jnp.dot(x2d, w_in_ref[half],
                    preferred_element_type=jnp.float32)
        y = y + b_in_ref[half]                              # (1, E) broadcast, f32
        # 8-aligned interior store -> unmasked vst.
        y_pad_ref[half, :, 8:8 + W, :] = y.reshape(rows, W, E).astype(cdt)

    # The padded input rows produce b_in (not zero) through project_in; the
    # dwconv's zero padding must be restored on image-border tiles only.
    @pl.when(t == 0)
    def _():
        y_pad_ref[:, 0:1, 8:8 + W, :] = jnp.zeros((2, 1, W, E), cdt)

    @pl.when(t == n_t - 1)
    def _():
        y_pad_ref[:, rows - 1:rows, 8:8 + W, :] = jnp.zeros((2, 1, W, E), cdt)

    # ---- depthwise 3x3 (stride 1, pad 1): 9 shifted VPU FMAs per half ------
    # Channels stay on lanes; taps are bf16 when compute_dtype=bf16 (2x VPU
    # packing on v6e/v7x) while the accumulator and bias adds stay f32.
    def dwconv(half):
        acc = jnp.zeros((TH, W, E), jnp.float32)
        for kh in range(3):
            for kw in range(3):
                tap = y_pad_ref[half, kh:kh + TH, 7 + kw:7 + kw + W, :]
                acc = acc + tap * w_dw_ref[half, kh, kw:kw + 1, :]
        return acc + b_dw_ref[half]

    x1 = dwconv(0)
    x2 = dwconv(1)

    # ---- gating ----
    # TODO(synk): PyTorch F.gelu defaults to the exact erf form; the tanh
    # approximation is used for guaranteed Mosaic/EUP lowering (~1e-3 diff).
    g = jax.nn.gelu(x1, approximate=True) * x2

    # ---- project_out: 1x1 conv == single full-K MXU matmul -----------------
    out = jnp.dot(g.reshape(TH * W, E).astype(cdt), w_out_ref[...],
                  preferred_element_type=jnp.float32)
    out = out + b_out_ref[...]
    o_ref[0, :, :, :] = out.reshape(TH, W, C).astype(o_ref.dtype)


def _pick_row_tile(H, N, target=32):
    """Largest divisor of H <= target (~32: v7x-safe; v5e/v6e can go larger).
    Splits further when N*T would leave a v7x TensorCore idle."""
    th = min(target, H)
    while H % th:
        th -= 1
    if N * (H // th) < 2 and th > 1:
        for cand in range(th - 1, 0, -1):
            if H % cand == 0:
                th = cand
                break
    return th


def feed_forward_nhwc(x_nhwc, w_in_oihw, b_in, w_dw_oihw, b_dw, w_out_oihw,
                      b_out, *, row_tile=None, compute_dtype=None):
    """Channels-last FeedForward core (preferred entry: no layout transposes).

    x_nhwc: (N, H, W, dim); weights in PyTorch OIHW layouts (see feed_forward).
    compute_dtype: None -> use x dtype (precise); jnp.bfloat16 recommended for
    v6e/v7x (MXU operands + dwconv scratch/taps in bf16, f32 accumulation).
    """
    N, H, W, C = x_nhwc.shape
    E2 = w_in_oihw.shape[0]
    E = E2 // 2
    dt = x_nhwc.dtype
    cdt = jnp.dtype(compute_dtype) if compute_dtype is not None else jnp.dtype(dt)

    if b_in is None:
        b_in = jnp.zeros((E2,), jnp.float32)
    if b_dw is None:
        b_dw = jnp.zeros((E2,), jnp.float32)
    if b_out is None:
        b_out = jnp.zeros((C,), jnp.float32)

    TH = _pick_row_tile(H, N) if row_tile is None else int(row_tile)
    assert H % TH == 0, (H, TH)
    T = H // TH

    # 1-row zero halo top/bottom; a single fusible pad (no intermediate-sized
    # activation pad, and the in-kernel halo rows are overwritten with zeros).
    x_pad = jnp.pad(x_nhwc, ((0, 0), (1, 1), (0, 0), (0, 0)))

    # Weights pre-split into the two chunk() halves (kernel never slices the
    # lane axis at a non-aligned offset), channels-last, compute dtype.
    w_in_k = jnp.transpose(w_in_oihw[:, :, 0, 0].reshape(2, E, C),
                           (0, 2, 1)).astype(cdt)                        # (2,C,E)
    b_in_k = b_in.reshape(2, 1, E).astype(jnp.float32)
    w_dw_k = jnp.transpose(w_dw_oihw[:, 0, :, :].reshape(2, E, 3, 3),
                           (0, 2, 3, 1)).astype(cdt)                     # (2,3,3,E)
    b_dw_k = b_dw.reshape(2, 1, E).astype(jnp.float32)
    w_out_k = jnp.transpose(w_out_oihw[:, :, 0, 0], (1, 0)).astype(cdt)  # (E,C)
    b_out_k = b_out.reshape(1, C).astype(jnp.float32)

    flops = (2 * N * H * W * C * E2            # project_in
             + 2 * 9 * N * H * W * E2          # depthwise 3x3
             + 10 * N * H * W * E              # gating (gelu poly + mul)
             + 2 * N * H * W * E * C)          # project_out
    act_bytes = jnp.dtype(dt).itemsize
    w_bytes = jnp.dtype(cdt).itemsize
    bytes_accessed = int(act_bytes * (N * (H + 2) * W * C + N * H * W * C)
                         + w_bytes * (2 * C * E + E * C + 2 * 9 * E)
                         + 4 * (2 * E2 + C))

    out_nhwc = pl.pallas_call(
        _ffn_kernel,
        out_shape=jax.ShapeDtypeStruct((N, H, W, C), dt),
        grid_spec=pltpu.PrefetchScalarGridSpec(
            num_scalar_prefetch=0,
            grid=(N, T),
            in_specs=[
                # Whole padded image per batch element; constant block index
                # across t => fetched once per n (revisited, no re-DMA).
                pl.BlockSpec((1, H + 2, W, C), lambda n, t: (n, 0, 0, 0)),
                pl.BlockSpec((2, C, E), lambda n, t: (0, 0, 0)),
                pl.BlockSpec((2, 1, E), lambda n, t: (0, 0, 0)),
                pl.BlockSpec((2, 3, 3, E), lambda n, t: (0, 0, 0, 0)),
                pl.BlockSpec((2, 1, E), lambda n, t: (0, 0, 0)),
                pl.BlockSpec((E, C), lambda n, t: (0, 0)),
                pl.BlockSpec((1, C), lambda n, t: (0, 0)),
            ],
            out_specs=pl.BlockSpec((1, TH, W, C), lambda n, t: (n, t, 0, 0)),
            # Per-half row strip with an 8-sublane-aligned interior at cols [8, 8+W).
            scratch_shapes=[pltpu.VMEM((2, TH + 2, W + 16, E), cdt)],
        ),
        compiler_params=pltpu.CompilerParams(
            dimension_semantics=("parallel", "parallel"),
            # 48 MiB: within v7x's 64 MiB physical VMEM; raise toward ~100 MiB
            # on v5e/v6e if using larger row tiles.
            vmem_limit_bytes=48 * 1024 * 1024),
        cost_estimate=pl.CostEstimate(
            flops=int(flops),
            transcendentals=int(N * H * W * E),
            bytes_accessed=bytes_accessed),
    )(x_pad, w_in_k, b_in_k, w_dw_k, b_dw_k, w_out_k, b_out_k)

    return out_nhwc


def feed_forward(x_nchw, w_in_oihw, b_in, w_dw_oihw, b_dw, w_out_oihw, b_out,
                 *, row_tile=None, compute_dtype=None):
    """FeedForward forward pass with PyTorch layouts (NCHW / OIHW) in and out.

    NOTE: the NCHW<->NHWC transposes below are pure HBM layout glue executed by
    XLA; keep activations NHWC across surrounding layers and call
    feed_forward_nhwc directly to avoid them (~3x activation HBM traffic).
    """
    x_nhwc = jnp.transpose(x_nchw, (0, 2, 3, 1))
    out_nhwc = feed_forward_nhwc(x_nhwc, w_in_oihw, b_in, w_dw_oihw, b_dw,
                                 w_out_oihw, b_out, row_tile=row_tile,
                                 compute_dtype=compute_dtype)
    return jnp.transpose(out_nhwc, (0, 3, 1, 2))


def feed_forward_ref(x, w_in, b_in, w_dw, b_dw, w_out, b_out):
    """Pure-JAX reference with nn.Conv2d semantics (NCHW / OIHW)."""
    dn = ("NCHW", "OIHW", "NCHW")
    hp = lax.Precision.HIGHEST
    y = lax.conv_general_dilated(x, w_in, (1, 1), "VALID",
                                 dimension_numbers=dn, precision=hp)
    if b_in is not None:
        y = y + b_in[None, :, None, None]
    y = lax.conv_general_dilated(y, w_dw, (1, 1), ((1, 1), (1, 1)),
                                 dimension_numbers=dn,
                                 feature_group_count=w_dw.shape[0],
                                 precision=hp)
    if b_dw is not None:
        y = y + b_dw[None, :, None, None]
    x1, x2 = jnp.split(y, 2, axis=1)
    # Same tanh-form GELU as the kernel (PyTorch's F.gelu default is erf-exact).
    g = jax.nn.gelu(x1, approximate=True) * x2
    out = lax.conv_general_dilated(g, w_out, (1, 1), "VALID",
                                   dimension_numbers=dn, precision=hp)
    if b_out is not None:
        out = out + b_out[None, :, None, None]
    return out


if __name__ == "__main__":
    # Small shapes consistent with the module's forward: batch=2, dim=16,
    # 16x16 spatial, ffn_expansion_factor=2 -> hidden=32, bias=True.
    N, C, H, W = 2, 16, 16, 16
    E = 32                      # hidden_features = int(dim * ffn_expansion_factor)
    E2 = 2 * E

    key = jax.random.PRNGKey(0)
    k = jax.random.split(key, 7)
    x = jax.random.normal(k[0], (N, C, H, W), jnp.float32)
    w_in = jax.random.normal(k[1], (E2, C, 1, 1), jnp.float32) * 0.1
    b_in = jax.random.normal(k[2], (E2,), jnp.float32) * 0.1
    w_dw = jax.random.normal(k[3], (E2, 1, 3, 3), jnp.float32) * 0.1
    b_dw = jax.random.normal(k[4], (E2,), jnp.float32) * 0.1
    w_out = jax.random.normal(k[5], (C, E, 1, 1), jnp.float32) * 0.1
    b_out = jax.random.normal(k[6], (C,), jnp.float32) * 0.1

    ref = feed_forward_ref(x, w_in, b_in, w_dw, b_dw, w_out, b_out)

    # Precise path (all-f32), explicit row tiling so the interior-halo
    # recomputation path (multi-tile H) is exercised and verified.
    out = feed_forward(x, w_in, b_in, w_dw, b_dw, w_out, b_out, row_tile=8)
    out = jax.block_until_ready(out)
    assert out.shape == (N, C, H, W)
    err = float(jnp.max(jnp.abs(out - ref)))
    assert jnp.allclose(out, ref, atol=1e-4, rtol=1e-4), err

    # Fast path: bf16 MXU operands + bf16 dwconv scratch/taps, f32 accumulation
    # (the v6e/v7x-recommended configuration); auto row tile.
    out_bf = feed_forward(x, w_in, b_in, w_dw, b_dw, w_out, b_out,
                          compute_dtype=jnp.bfloat16)
    out_bf = jax.block_until_ready(out_bf)
    err_bf = float(jnp.max(jnp.abs(out_bf - ref)))
    assert jnp.allclose(out_bf, ref, atol=5e-2, rtol=5e-2), err_bf

    print("KERNEL_OK")
</pallas_src>

<mosaic_0001>
module attributes {stable_mosaic.version = 11 : i64} {
  func.func @_ffn_kernel(%arg0: i32, %arg1: i32, %arg2: memref<1x18x16x16xf32, #tpu.memory_space<vmem>>, %arg3: memref<2x16x32xf32, #tpu.memory_space<vmem>>, %arg4: memref<2x1x32xf32, #tpu.memory_space<vmem>>, %arg5: memref<2x3x3x32xf32, #tpu.memory_space<vmem>>, %arg6: memref<2x1x32xf32, #tpu.memory_space<vmem>>, %arg7: memref<32x16xf32, #tpu.memory_space<vmem>>, %arg8: memref<1x16xf32, #tpu.memory_space<vmem>>, %arg9: memref<1x8x16x16xf32, #tpu.memory_space<vmem>>, %arg10: memref<2x10x32x32xf32, #tpu.memory_space<vmem>>) attributes {dimension_semantics = [#tpu.dimension_semantics<parallel>, #tpu.dimension_semantics<parallel>], iteration_bounds = array<i64: 2, 2>, scalar_prefetch = 0 : i64, scratch_operands = 1 : i64, tpu.core_type = #tpu.core_type<tc>, window_params = [{transform_indices = @transform_0, window_bounds = array<i64: 1, 18, 16, 16>}, {pipeline_mode = #tpu.pipeline_mode<synchronous>, transform_indices = @transform_1, window_bounds = array<i64: 2, 16, 32>}, {pipeline_mode = #tpu.pipeline_mode<synchronous>, transform_indices = @transform_2, window_bounds = array<i64: 2, 1, 32>}, {pipeline_mode = #tpu.pipeline_mode<synchronous>, transform_indices = @transform_3, window_bounds = array<i64: 2, 3, 3, 32>}, {pipeline_mode = #tpu.pipeline_mode<synchronous>, transform_indices = @transform_4, window_bounds = array<i64: 2, 1, 32>}, {pipeline_mode = #tpu.pipeline_mode<synchronous>, transform_indices = @transform_5, window_bounds = array<i64: 32, 16>}, {pipeline_mode = #tpu.pipeline_mode<synchronous>, transform_indices = @transform_6, window_bounds = array<i64: 1, 16>}, {transform_indices = @transform_7, window_bounds = array<i64: 1, 8, 16, 16>}]} {
    %cst = arith.constant 0.000000e+00 : f32
    %0 = vector.broadcast %cst : f32 to vector<2x10x8x32xf32>
    %c0 = arith.constant 0 : index
    %c0_0 = arith.constant 0 : index
    %c0_1 = arith.constant 0 : index
    %c0_2 = arith.constant 0 : index
    %1 = vector.load %arg10[%c0, %c0_0, %c0_1, %c0_2] : memref<2x10x32x32xf32, #tpu.memory_space<vmem>>, vector<2x10x8x32xf32>
    tpu.vector_store %arg10[%c0, %c0_0, %c0_1, %c0_2], %0 {strides = array<i32>} : memref<2x10x32x32xf32, #tpu.memory_space<vmem>>, vector<2x10x8x32xf32>,
    %cst_3 = arith.constant 0.000000e+00 : f32
    %2 = vector.broadcast %cst_3 : f32 to vector<2x10x8x32xf32>
    %c0_4 = arith.constant 0 : index
    %c0_5 = arith.constant 0 : index
    %c24 = arith.constant 24 : index
    %c0_6 = arith.constant 0 : index
    %3 = vector.load %arg10[%c0_4, %c0_5, %c24, %c0_6] : memref<2x10x32x32xf32, #tpu.memory_space<vmem>>, vector<2x10x8x32xf32>
    tpu.vector_store %arg10[%c0_4, %c0_5, %c24, %c0_6], %2 {strides = array<i32>} : memref<2x10x32x32xf32, #tpu.memory_space<vmem>>, vector<2x10x8x32xf32>,
    %c8_i32 = arith.constant 8 : i32
    %4 = arith.muli %arg1, %c8_i32 : i32
    %5 = tpu.assume_multiple %4, 8 : i32
    %c0_7 = arith.constant 0 : index
    %6 = arith.index_cast %5 : i32 to index
    %c0_8 = arith.constant 0 : index
    %c0_9 = arith.constant 0 : index
    %7 = vector.load %arg2[%c0_7, %6, %c0_8, %c0_9] : memref<1x18x16x16xf32, #tpu.memory_space<vmem>>, vector<1x10x16x16xf32>
    %8 = vector.shape_cast %7 : vector<1x10x16x16xf32> to vector<10x16x16xf32>
    %9 = vector.shape_cast %8 : vector<10x16x16xf32> to vector<160x16xf32>
    %c0_10 = arith.constant 0 : index
    %c0_11 = arith.constant 0 : index
    %c0_12 = arith.constant 0 : index
    %10 = vector.load %arg3[%c0_10, %c0_11, %c0_12] : memref<2x16x32xf32, #tpu.memory_space<vmem>>, vector<1x16x32xf32>
    %11 = vector.shape_cast %10 : vector<1x16x32xf32> to vector<16x32xf32>
    %cst_13 = arith.constant dense<0.000000e+00> : vector<160x32xf32>
    %12 = tpu.matmul %9, %11, %cst_13 {dimension_numbers = #tpu.dot_dimension_numbers<[1], [0], [0], [1], [0, 0, 1, 1], [], []>} : vector<160x16xf32>, vector<16x32xf32>, vector<160x32xf32> -> vector<160x32xf32>
    %c0_14 = arith.constant 0 : index
    %c0_15 = arith.constant 0 : index
    %c0_16 = arith.constant 0 : index
    %13 = vector.load %arg4[%c0_14, %c0_15, %c0_16] : memref<2x1x32xf32, #tpu.memory_space<vmem>>, vector<1x1x32xf32>
    %14 = vector.shape_cast %13 : vector<1x1x32xf32> to vector<1x32xf32>
    %15 = vector.broadcast %14 : vector<1x32xf32> to vector<160x32xf32>
    %16 = arith.addf %12, %15 : vector<160x32xf32>
    %17 = vector.shape_cast %16 : vector<160x32xf32> to vector<10x16x32xf32>
    %c0_17 = arith.constant 0 : index
    %c0_18 = arith.constant 0 : index
    %c8 = arith.constant 8 : index
    %c0_19 = arith.constant 0 : index
    %18 = vector.load %arg10[%c0_17, %c0_18, %c8, %c0_19] : memref<2x10x32x32xf32, #tpu.memory_space<vmem>>, vector<1x10x16x32xf32>
    %19 = vector.shape_cast %18 : vector<1x10x16x32xf32> to vector<10x16x32xf32>
    %20 = vector.shape_cast %17 : vector<10x16x32xf32> to vector<1x10x16x32xf32>
    tpu.vector_store %arg10[%c0_17, %c0_18, %c8, %c0_19], %20 {strides = array<i32>} : memref<2x10x32x32xf32, #tpu.memory_space<vmem>>, vector<1x10x16x32xf32>,
    %c1 = arith.constant 1 : index
    %c0_20 = arith.constant 0 : index
    %c0_21 = arith.constant 0 : index
    %21 = vector.load %arg3[%c1, %c0_20, %c0_21] : memref<2x16x32xf32, #tpu.memory_space<vmem>>, vector<1x16x32xf32>
    %22 = vector.shape_cast %21 : vector<1x16x32xf32> to vector<16x32xf32>
    %cst_22 = arith.constant dense<0.000000e+00> : vector<160x32xf32>
    %23 = tpu.matmul %9, %22, %cst_22 {dimension_numbers = #tpu.dot_dimension_numbers<[1], [0], [0], [1], [0, 0, 1, 1], [], []>} : vector<160x16xf32>, vector<16x32xf32>, vector<160x32xf32> -> vector<160x32xf32>
    %c1_23 = arith.constant 1 : index
    %c0_24 = arith.constant 0 : index
    %c0_25 = arith.constant 0 : index
    %24 = vector.load %arg4[%c1_23, %c0_24, %c0_25] : memref<2x1x32xf32, #tpu.memory_space<vmem>>, vector<1x1x32xf32>
    %25 = vector.shape_cast %24 : vector<1x1x32xf32> to vector<1x32xf32>
    %26 = vector.broadcast %25 : vector<1x32xf32> to vector<160x32xf32>
    %27 = arith.addf %23, %26 : vector<160x32xf32>
    %28 = vector.shape_cast %27 : vector<160x32xf32> to vector<10x16x32xf32>
    %c1_26 = arith.constant 1 : index
    %c0_27 = arith.constant 0 : index
    %c8_28 = arith.constant 8 : index
    %c0_29 = arith.constant 0 : index
    %29 = vector.load %arg10[%c1_26, %c0_27, %c8_28, %c0_29] : memref<2x10x32x32xf32, #tpu.memory_space<vmem>>, vector<1x10x16x32xf32>
    %30 = vector.shape_cast %29 : vector<1x10x16x32xf32> to vector<10x16x32xf32>
    %31 = vector.shape_cast %28 : vector<10x16x32xf32> to vector<1x10x16x32xf32>
    tpu.vector_store %arg10[%c1_26, %c0_27, %c8_28, %c0_29], %31 {strides = array<i32>} : memref<2x10x32x32xf32, #tpu.memory_space<vmem>>, vector<1x10x16x32xf32>,
    %c0_i32 = arith.constant 0 : i32
    %32 = arith.cmpi eq, %arg1, %c0_i32 : i32
    %33 = arith.extui %32 : i1 to i32
    %c0_i32_30 = arith.constant 0 : i32
    %34 = arith.cmpi ne, %33, %c0_i32_30 : i32
    scf.if %34 {
      %cst_194 = arith.constant 0.000000e+00 : f32
      %218 = vector.broadcast %cst_194 : f32 to vector<2x1x16x32xf32>
      %c0_195 = arith.constant 0 : index
      %c0_196 = arith.constant 0 : index
      %c8_197 = arith.constant 8 : index
      %c0_198 = arith.constant 0 : index
      %219 = vector.load %arg10[%c0_195, %c0_196, %c8_197, %c0_198] : memref<2x10x32x32xf32, #tpu.memory_space<vmem>>, vector<2x1x16x32xf32>
      tpu.vector_store %arg10[%c0_195, %c0_196, %c8_197, %c0_198], %218 {strides = array<i32>} : memref<2x10x32x32xf32, #tpu.memory_space<vmem>>, vector<2x1x16x32xf32>,
    } else {
    }
    %c1_i32 = arith.constant 1 : i32
    %35 = arith.cmpi eq, %arg1, %c1_i32 : i32
    %36 = arith.extui %35 : i1 to i32
    %c0_i32_31 = arith.constant 0 : i32
    %37 = arith.cmpi ne, %36, %c0_i32_31 : i32
    scf.if %37 {
      %cst_194 = arith.constant 0.000000e+00 : f32
      %218 = vector.broadcast %cst_194 : f32 to vector<2x1x16x32xf32>
      %c0_195 = arith.constant 0 : index
      %c9_196 = arith.constant 9 : index
      %c8_197 = arith.constant 8 : index
      %c0_198 = arith.constant 0 : index
      %219 = vector.load %arg10[%c0_195, %c9_196, %c8_197, %c0_198] : memref<2x10x32x32xf32, #tpu.memory_space<vmem>>, vector<2x1x16x32xf32>
      tpu.vector_store %arg10[%c0_195, %c9_196, %c8_197, %c0_198], %218 {strides = array<i32>} : memref<2x10x32x32xf32, #tpu.memory_space<vmem>>, vector<2x1x16x32xf32>,
    } else {
    }
    %cst_32 = arith.constant 0.000000e+00 : f32
    %38 = vector.broadcast %cst_32 : f32 to vector<8x16x32xf32>
    %c0_33 = arith.constant 0 : index
    %c0_34 = arith.constant 0 : index
    %c7 = arith.constant 7 : index
    %c0_35 = arith.constant 0 : index
    %39 = vector.load %arg10[%c0_33, %c0_34, %c7, %c0_35] : memref<2x10x32x32xf32, #tpu.memory_space<vmem>>, vector<1x8x16x32xf32>
    %40 = vector.shape_cast %39 : vector<1x8x16x32xf32> to vector<8x16x32xf32>
    %c0_36 = arith.constant 0 : index
    %c0_37 = arith.constant 0 : index
    %c0_38 = arith.constant 0 : index
    %c0_39 = arith.constant 0 : index
    %41 = vector.load %arg5[%c0_36, %c0_37, %c0_38, %c0_39] : memref<2x3x3x32xf32, #tpu.memory_space<vmem>>, vector<1x1x1x32xf32>
    %42 = vector.shape_cast %41 : vector<1x1x1x32xf32> to vector<1x32xf32>
    %43 = vector.shape_cast %42 : vector<1x32xf32> to vector<1x1x32xf32>
    %44 = vector.broadcast %43 : vector<1x1x32xf32> to vector<8x16x32xf32>
    %45 = arith.mulf %40, %44 : vector<8x16x32xf32>
    %46 = arith.addf %38, %45 : vector<8x16x32xf32>
    %c0_40 = arith.constant 0 : index
    %c0_41 = arith.constant 0 : index
    %c8_42 = arith.constant 8 : index
    %c0_43 = arith.constant 0 : index
    %47 = vector.load %arg10[%c0_40, %c0_41, %c8_42, %c0_43] : memref<2x10x32x32xf32, #tpu.memory_space<vmem>>, vector<1x8x16x32xf32>
    %48 = vector.shape_cast %47 : vector<1x8x16x32xf32> to vector<8x16x32xf32>
    %c0_44 = arith.constant 0 : index
    %c0_45 = arith.constant 0 : index
    %c1_46 = arith.constant 1 : index
    %c0_47 = arith.constant 0 : index
    %49 = vector.load %arg5[%c0_44, %c0_45, %c1_46, %c0_47] : memref<2x3x3x32xf32, #tpu.memory_space<vmem>>, vector<1x1x1x32xf32>
    %50 = vector.shape_cast %49 : vector<1x1x1x32xf32> to vector<1x32xf32>
    %51 = vector.shape_cast %50 : vector<1x32xf32> to vector<1x1x32xf32>
    %52 = vector.broadcast %51 : vector<1x1x32xf32> to vector<8x16x32xf32>
    %53 = arith.mulf %48, %52 : vector<8x16x32xf32>
    %54 = arith.addf %46, %53 : vector<8x16x32xf32>
    %c0_48 = arith.constant 0 : index
    %c0_49 = arith.constant 0 : index
    %c9 = arith.constant 9 : index
    %c0_50 = arith.constant 0 : index
    %55 = vector.load %arg10[%c0_48, %c0_49, %c9, %c0_50] : memref<2x10x32x32xf32, #tpu.memory_space<vmem>>, vector<1x8x16x32xf32>
    %56 = vector.shape_cast %55 : vector<1x8x16x32xf32> to vector<8x16x32xf32>
    %c0_51 = arith.constant 0 : index
    %c0_52 = arith.constant 0 : index
    %c2 = arith.constant 2 : index
    %c0_53 = arith.constant 0 : index
    %57 = vector.load %arg5[%c0_51, %c0_52, %c2, %c0_53] : memref<2x3x3x32xf32, #tpu.memory_space<vmem>>, vector<1x1x1x32xf32>
    %58 = vector.shape_cast %57 : vector<1x1x1x32xf32> to vector<1x32xf32>
    %59 = vector.shape_cast %58 : vector<1x32xf32> to vector<1x1x32xf32>
    %60 = vector.broadcast %59 : vector<1x1x32xf32> to vector<8x16x32xf32>
    %61 = arith.mulf %56, %60 : vector<8x16x32xf32>
    %62 = arith.addf %54, %61 : vector<8x16x32xf32>
    %c0_54 = arith.constant 0 : index
    %c1_55 = arith.constant 1 : index
    %c7_56 = arith.constant 7 : index
    %c0_57 = arith.constant 0 : index
    %63 = vector.load %arg10[%c0_54, %c1_55, %c7_56, %c0_57] : memref<2x10x32x32xf32, #tpu.memory_space<vmem>>, vector<1x8x16x32xf32>
    %64 = vector.shape_cast %63 : vector<1x8x16x32xf32> to vector<8x16x32xf32>
    %c0_58 = arith.constant 0 : index
    %c1_59 = arith.constant 1 : index
    %c0_60 = arith.constant 0 : index
    %c0_61 = arith.constant 0 : index
    %65 = vector.load %arg5[%c0_58, %c1_59, %c0_60, %c0_61] : memref<2x3x3x32xf32, #tpu.memory_space<vmem>>, vector<1x1x1x32xf32>
    %66 = vector.shape_cast %65 : vector<1x1x1x32xf32> to vector<1x32xf32>
    %67 = vector.shape_cast %66 : vector<1x32xf32> to vector<1x1x32xf32>
    %68 = vector.broadcast %67 : vector<1x1x32xf32> to vector<8x16x32xf32>
    %69 = arith.mulf %64, %68 : vector<8x16x32xf32>
    %70 = arith.addf %62, %69 : vector<8x16x32xf32>
    %c0_62 = arith.constant 0 : index
    %c1_63 = arith.constant 1 : index
    %c8_64 = arith.constant 8 : index
    %c0_65 = arith.constant 0 : index
    %71 = vector.load %arg10[%c0_62, %c1_63, %c8_64, %c0_65] : memref<2x10x32x32xf32, #tpu.memory_space<vmem>>, vector<1x8x16x32xf32>
    %72 = vector.shape_cast %71 : vector<1x8x16x32xf32> to vector<8x16x32xf32>
    %c0_66 = arith.constant 0 : index
    %c1_67 = arith.constant 1 : index
    %c1_68 = arith.constant 1 : index
    %c0_69 = arith.constant 0 : index
    %73 = vector.load %arg5[%c0_66, %c1_67, %c1_68, %c0_69] : memref<2x3x3x32xf32, #tpu.memory_space<vmem>>, vector<1x1x1x32xf32>
    %74 = vector.shape_cast %73 : vector<1x1x1x32xf32> to vector<1x32xf32>
    %75 = vector.shape_cast %74 : vector<1x32xf32> to vector<1x1x32xf32>
    %76 = vector.broadcast %75 : vector<1x1x32xf32> to vector<8x16x32xf32>
    %77 = arith.mulf %72, %76 : vector<8x16x32xf32>
    %78 = arith.addf %70, %77 : vector<8x16x32xf32>
    %c0_70 = arith.constant 0 : index
    %c1_71 = arith.constant 1 : index
    %c9_72 = arith.constant 9 : index
    %c0_73 = arith.constant 0 : index
    %79 = vector.load %arg10[%c0_70, %c1_71, %c9_72, %c0_73] : memref<2x10x32x32xf32, #tpu.memory_space<vmem>>, vector<1x8x16x32xf32>
    %80 = vector.shape_cast %79 : vector<1x8x16x32xf32> to vector<8x16x32xf32>
    %c0_74 = arith.constant 0 : index
    %c1_75 = arith.constant 1 : index
    %c2_76 = arith.constant 2 : index
    %c0_77 = arith.constant 0 : index
    %81 = vector.load %arg5[%c0_74, %c1_75, %c2_76, %c0_77] : memref<2x3x3x32xf32, #tpu.memory_space<vmem>>, vector<1x1x1x32xf32>
    %82 = vector.shape_cast %81 : vector<1x1x1x32xf32> to vector<1x32xf32>
    %83 = vector.shape_cast %82 : vector<1x32xf32> to vector<1x1x32xf32>
    %84 = vector.broadcast %83 : vector<1x1x32xf32> to vector<8x16x32xf32>
    %85 = arith.mulf %80, %84 : vector<8x16x32xf32>
    %86 = arith.addf %78, %85 : vector<8x16x32xf32>
    %c0_78 = arith.constant 0 : index
    %c2_79 = arith.constant 2 : index
    %c7_80 = arith.constant 7 : index
    %c0_81 = arith.constant 0 : index
    %87 = vector.load %arg10[%c0_78, %c2_79, %c7_80, %c0_81] : memref<2x10x32x32xf32, #tpu.memory_space<vmem>>, vector<1x8x16x32xf32>
    %88 = vector.shape_cast %87 : vector<1x8x16x32xf32> to vector<8x16x32xf32>
    %c0_82 = arith.constant 0 : index
    %c2_83 = arith.constant 2 : index
    %c0_84 = arith.constant 0 : index
    %c0_85 = arith.constant 0 : index
    %89 = vector.load %arg5[%c0_82, %c2_83, %c0_84, %c0_85] : memref<2x3x3x32xf32, #tpu.memory_space<vmem>>, vector<1x1x1x32xf32>
    %90 = vector.shape_cast %89 : vector<1x1x1x32xf32> to vector<1x32xf32>
    %91 = vector.shape_cast %90 : vector<1x32xf32> to vector<1x1x32xf32>
    %92 = vector.broadcast %91 : vector<1x1x32xf32> to vector<8x16x32xf32>
    %93 = arith.mulf %88, %92 : vector<8x16x32xf32>
    %94 = arith.addf %86, %93 : vector<8x16x32xf32>
    %c0_86 = arith.constant 0 : index
    %c2_87 = arith.constant 2 : index
    %c8_88 = arith.constant 8 : index
    %c0_89 = arith.constant 0 : index
    %95 = vector.load %arg10[%c0_86, %c2_87, %c8_88, %c0_89] : memref<2x10x32x32xf32, #tpu.memory_space<vmem>>, vector<1x8x16x32xf32>
    %96 = vector.shape_cast %95 : vector<1x8x16x32xf32> to vector<8x16x32xf32>
    %c0_90 = arith.constant 0 : index
    %c2_91 = arith.constant 2 : index
    %c1_92 = arith.constant 1 : index
    %c0_93 = arith.constant 0 : index
    %97 = vector.load %arg5[%c0_90, %c2_91, %c1_92, %c0_93] : memref<2x3x3x32xf32, #tpu.memory_space<vmem>>, vector<1x1x1x32xf32>
    %98 = vector.shape_cast %97 : vector<1x1x1x32xf32> to vector<1x32xf32>
    %99 = vector.shape_cast %98 : vector<1x32xf32> to vector<1x1x32xf32>
    %100 = vector.broadcast %99 : vector<1x1x32xf32> to vector<8x16x32xf32>
    %101 = arith.mulf %96, %100 : vector<8x16x32xf32>
    %102 = arith.addf %94, %101 : vector<8x16x32xf32>
    %c0_94 = arith.constant 0 : index
    %c2_95 = arith.constant 2 : index
    %c9_96 = arith.constant 9 : index
    %c0_97 = arith.constant 0 : index
    %103 = vector.load %arg10[%c0_94, %c2_95, %c9_96, %c0_97] : memref<2x10x32x32xf32, #tpu.memory_space<vmem>>, vector<1x8x16x32xf32>
    %104 = vector.shape_cast %103 : vector<1x8x16x32xf32> to vector<8x16x32xf32>
    %c0_98 = arith.constant 0 : index
    %c2_99 = arith.constant 2 : index
    %c2_100 = arith.constant 2 : index
    %c0_101 = arith.constant 0 : index
    %105 = vector.load %arg5[%c0_98, %c2_99, %c2_100, %c0_101] : memref<2x3x3x32xf32, #tpu.memory_space<vmem>>, vector<1x1x1x32xf32>
    %106 = vector.shape_cast %105 : vector<1x1x1x32xf32> to vector<1x32xf32>
    %107 = vector.shape_cast %106 : vector<1x32xf32> to vector<1x1x32xf32>
    %108 = vector.broadcast %107 : vector<1x1x32xf32> to vector<8x16x32xf32>
    %109 = arith.mulf %104, %108 : vector<8x16x32xf32>
    %110 = arith.addf %102, %109 : vector<8x16x32xf32>
    %c0_102 = arith.constant 0 : index
    %c0_103 = arith.constant 0 : index
    %c0_104 = arith.constant 0 : index
    %111 = vector.load %arg6[%c0_102, %c0_103, %c0_104] : memref<2x1x32xf32, #tpu.memory_space<vmem>>, vector<1x1x32xf32>
    %112 = vector.shape_cast %111 : vector<1x1x32xf32> to vector<1x32xf32>
    %113 = vector.shape_cast %112 : vector<1x32xf32> to vector<1x1x32xf32>
    %114 = vector.broadcast %113 : vector<1x1x32xf32> to vector<8x16x32xf32>
    %115 = arith.addf %110, %114 : vector<8x16x32xf32>
    %cst_105 = arith.constant 0.000000e+00 : f32
    %116 = vector.broadcast %cst_105 : f32 to vector<8x16x32xf32>
    %c1_106 = arith.constant 1 : index
    %c0_107 = arith.constant 0 : index
    %c7_108 = arith.constant 7 : index
    %c0_109 = arith.constant 0 : index
    %117 = vector.load %arg10[%c1_106, %c0_107, %c7_108, %c0_109] : memref<2x10x32x32xf32, #tpu.memory_space<vmem>>, vector<1x8x16x32xf32>
    %118 = vector.shape_cast %117 : vector<1x8x16x32xf32> to vector<8x16x32xf32>
    %c1_110 = arith.constant 1 : index
    %c0_111 = arith.constant 0 : index
    %c0_112 = arith.constant 0 : index
    %c0_113 = arith.constant 0 : index
    %119 = vector.load %arg5[%c1_110, %c0_111, %c0_112, %c0_113] : memref<2x3x3x32xf32, #tpu.memory_space<vmem>>, vector<1x1x1x32xf32>
    %120 = vector.shape_cast %119 : vector<1x1x1x32xf32> to vector<1x32xf32>
    %121 = vector.shape_cast %120 : vector<1x32xf32> to vector<1x1x32xf32>
    %122 = vector.broadcast %121 : vector<1x1x32xf32> to vector<8x16x32xf32>
    %123 = arith.mulf %118, %122 : vector<8x16x32xf32>
    %124 = arith.addf %116, %123 : vector<8x16x32xf32>
    %c1_114 = arith.constant 1 : index
    %c0_115 = arith.constant 0 : index
    %c8_116 = arith.constant 8 : index
    %c0_117 = arith.constant 0 : index
    %125 = vector.load %arg10[%c1_114, %c0_115, %c8_116, %c0_117] : memref<2x10x32x32xf32, #tpu.memory_space<vmem>>, vector<1x8x16x32xf32>
    %126 = vector.shape_cast %125 : vector<1x8x16x32xf32> to vector<8x16x32xf32>
    %c1_118 = arith.constant 1 : index
    %c0_119 = arith.constant 0 : index
    %c1_120 = arith.constant 1 : index
    %c0_121 = arith.constant 0 : index
    %127 = vector.load %arg5[%c1_118, %c0_119, %c1_120, %c0_121] : memref<2x3x3x32xf32, #tpu.memory_space<vmem>>, vector<1x1x1x32xf32>
    %128 = vector.shape_cast %127 : vector<1x1x1x32xf32> to vector<1x32xf32>
    %129 = vector.shape_cast %128 : vector<1x32xf32> to vector<1x1x32xf32>
    %130 = vector.broadcast %129 : vector<1x1x32xf32> to vector<8x16x32xf32>
    %131 = arith.mulf %126, %130 : vector<8x16x32xf32>
    %132 = arith.addf %124, %131 : vector<8x16x32xf32>
    %c1_122 = arith.constant 1 : index
    %c0_123 = arith.constant 0 : index
    %c9_124 = arith.constant 9 : index
    %c0_125 = arith.constant 0 : index
    %133 = vector.load %arg10[%c1_122, %c0_123, %c9_124, %c0_125] : memref<2x10x32x32xf32, #tpu.memory_space<vmem>>, vector<1x8x16x32xf32>
    %134 = vector.shape_cast %133 : vector<1x8x16x32xf32> to vector<8x16x32xf32>
    %c1_126 = arith.constant 1 : index
    %c0_127 = arith.constant 0 : index
    %c2_128 = arith.constant 2 : index
    %c0_129 = arith.constant 0 : index
    %135 = vector.load %arg5[%c1_126, %c0_127, %c2_128, %c0_129] : memref<2x3x3x32xf32, #tpu.memory_space<vmem>>, vector<1x1x1x32xf32>
    %136 = vector.shape_cast %135 : vector<1x1x1x32xf32> to vector<1x32xf32>
    %137 = vector.shape_cast %136 : vector<1x32xf32> to vector<1x1x32xf32>
    %138 = vector.broadcast %137 : vector<1x1x32xf32> to vector<8x16x32xf32>
    %139 = arith.mulf %134, %138 : vector<8x16x32xf32>
    %140 = arith.addf %132, %139 : vector<8x16x32xf32>
    %c1_130 = arith.constant 1 : index
    %c1_131 = arith.constant 1 : index
    %c7_132 = arith.constant 7 : index
    %c0_133 = arith.constant 0 : index
    %141 = vector.load %arg10[%c1_130, %c1_131, %c7_132, %c0_133] : memref<2x10x32x32xf32, #tpu.memory_space<vmem>>, vector<1x8x16x32xf32>
    %142 = vector.shape_cast %141 : vector<1x8x16x32xf32> to vector<8x16x32xf32>
    %c1_134 = arith.constant 1 : index
    %c1_135 = arith.constant 1 : index
    %c0_136 = arith.constant 0 : index
    %c0_137 = arith.constant 0 : index
    %143 = vector.load %arg5[%c1_134, %c1_135, %c0_136, %c0_137] : memref<2x3x3x32xf32, #tpu.memory_space<vmem>>, vector<1x1x1x32xf32>
    %144 = vector.shape_cast %143 : vector<1x1x1x32xf32> to vector<1x32xf32>
    %145 = vector.shape_cast %144 : vector<1x32xf32> to vector<1x1x32xf32>
    %146 = vector.broadcast %145 : vector<1x1x32xf32> to vector<8x16x32xf32>
    %147 = arith.mulf %142, %146 : vector<8x16x32xf32>
    %148 = arith.addf %140, %147 : vector<8x16x32xf32>
    %c1_138 = arith.constant 1 : index
    %c1_139 = arith.constant 1 : index
    %c8_140 = arith.constant 8 : index
    %c0_141 = arith.constant 0 : index
    %149 = vector.load %arg10[%c1_138, %c1_139, %c8_140, %c0_141] : memref<2x10x32x32xf32, #tpu.memory_space<vmem>>, vector<1x8x16x32xf32>
    %150 = vector.shape_cast %149 : vector<1x8x16x32xf32> to vector<8x16x32xf32>
    %c1_142 = arith.constant 1 : index
    %c1_143 = arith.constant 1 : index
    %c1_144 = arith.constant 1 : index
    %c0_145 = arith.constant 0 : index
    %151 = vector.load %arg5[%c1_142, %c1_143, %c1_144, %c0_145] : memref<2x3x3x32xf32, #tpu.memory_space<vmem>>, vector<1x1x1x32xf32>
    %152 = vector.shape_cast %151 : vector<1x1x1x32xf32> to vector<1x32xf32>
    %153 = vector.shape_cast %152 : vector<1x32xf32> to vector<1x1x32xf32>
    %154 = vector.broadcast %153 : vector<1x1x32xf32> to vector<8x16x32xf32>
    %155 = arith.mulf %150, %154 : vector<8x16x32xf32>
    %156 = arith.addf %148, %155 : vector<8x16x32xf32>
    %c1_146 = arith.constant 1 : index
    %c1_147 = arith.constant 1 : index
    %c9_148 = arith.constant 9 : index
    %c0_149 = arith.constant 0 : index
    %157 = vector.load %arg10[%c1_146, %c1_147, %c9_148, %c0_149] : memref<2x10x32x32xf32, #tpu.memory_space<vmem>>, vector<1x8x16x32xf32>
    %158 = vector.shape_cast %157 : vector<1x8x16x32xf32> to vector<8x16x32xf32>
    %c1_150 = arith.constant 1 : index
    %c1_151 = arith.constant 1 : index
    %c2_152 = arith.constant 2 : index
    %c0_153 = arith.constant 0 : index
    %159 = vector.load %arg5[%c1_150, %c1_151, %c2_152, %c0_153] : memref<2x3x3x32xf32, #tpu.memory_space<vmem>>, vector<1x1x1x32xf32>
    %160 = vector.shape_cast %159 : vector<1x1x1x32xf32> to vector<1x32xf32>
    %161 = vector.shape_cast %160 : vector<1x32xf32> to vector<1x1x32xf32>
    %162 = vector.broadcast %161 : vector<1x1x32xf32> to vector<8x16x32xf32>
    %163 = arith.mulf %158, %162 : vector<8x16x32xf32>
    %164 = arith.addf %156, %163 : vector<8x16x32xf32>
    %c1_154 = arith.constant 1 : index
    %c2_155 = arith.constant 2 : index
    %c7_156 = arith.constant 7 : index
    %c0_157 = arith.constant 0 : index
    %165 = vector.load %arg10[%c1_154, %c2_155, %c7_156, %c0_157] : memref<2x10x32x32xf32, #tpu.memory_space<vmem>>, vector<1x8x16x32xf32>
    %166 = vector.shape_cast %165 : vector<1x8x16x32xf32> to vector<8x16x32xf32>
    %c1_158 = arith.constant 1 : index
    %c2_159 = arith.constant 2 : index
    %c0_160 = arith.constant 0 : index
    %c0_161 = arith.constant 0 : index
    %167 = vector.load %arg5[%c1_158, %c2_159, %c0_160, %c0_161] : memref<2x3x3x32xf32, #tpu.memory_space<vmem>>, vector<1x1x1x32xf32>
    %168 = vector.shape_cast %167 : vector<1x1x1x32xf32> to vector<1x32xf32>
    %169 = vector.shape_cast %168 : vector<1x32xf32> to vector<1x1x32xf32>
    %170 = vector.broadcast %169 : vector<1x1x32xf32> to vector<8x16x32xf32>
    %171 = arith.mulf %166, %170 : vector<8x16x32xf32>
    %172 = arith.addf %164, %171 : vector<8x16x32xf32>
    %c1_162 = arith.constant 1 : index
    %c2_163 = arith.constant 2 : index
    %c8_164 = arith.constant 8 : index
    %c0_165 = arith.constant 0 : index
    %173 = vector.load %arg10[%c1_162, %c2_163, %c8_164, %c0_165] : memref<2x10x32x32xf32, #tpu.memory_space<vmem>>, vector<1x8x16x32xf32>
    %174 = vector.shape_cast %173 : vector<1x8x16x32xf32> to vector<8x16x32xf32>
    %c1_166 = arith.constant 1 : index
    %c2_167 = arith.constant 2 : index
    %c1_168 = arith.constant 1 : index
    %c0_169 = arith.constant 0 : index
    %175 = vector.load %arg5[%c1_166, %c2_167, %c1_168, %c0_169] : memref<2x3x3x32xf32, #tpu.memory_space<vmem>>, vector<1x1x1x32xf32>
    %176 = vector.shape_cast %175 : vector<1x1x1x32xf32> to vector<1x32xf32>
    %177 = vector.shape_cast %176 : vector<1x32xf32> to vector<1x1x32xf32>
    %178 = vector.broadcast %177 : vector<1x1x32xf32> to vector<8x16x32xf32>
    %179 = arith.mulf %174, %178 : vector<8x16x32xf32>
    %180 = arith.addf %172, %179 : vector<8x16x32xf32>
    %c1_170 = arith.constant 1 : index
    %c2_171 = arith.constant 2 : index
    %c9_172 = arith.constant 9 : index
    %c0_173 = arith.constant 0 : index
    %181 = vector.load %arg10[%c1_170, %c2_171, %c9_172, %c0_173] : memref<2x10x32x32xf32, #tpu.memory_space<vmem>>, vector<1x8x16x32xf32>
    %182 = vector.shape_cast %181 : vector<1x8x16x32xf32> to vector<8x16x32xf32>
    %c1_174 = arith.constant 1 : index
    %c2_175 = arith.constant 2 : index
    %c2_176 = arith.constant 2 : index
    %c0_177 = arith.constant 0 : index
    %183 = vector.load %arg5[%c1_174, %c2_175, %c2_176, %c0_177] : memref<2x3x3x32xf32, #tpu.memory_space<vmem>>, vector<1x1x1x32xf32>
    %184 = vector.shape_cast %183 : vector<1x1x1x32xf32> to vector<1x32xf32>
    %185 = vector.shape_cast %184 : vector<1x32xf32> to vector<1x1x32xf32>
    %186 = vector.broadcast %185 : vector<1x1x32xf32> to vector<8x16x32xf32>
    %187 = arith.mulf %182, %186 : vector<8x16x32xf32>
    %188 = arith.addf %180, %187 : vector<8x16x32xf32>
    %c1_178 = arith.constant 1 : index
    %c0_179 = arith.constant 0 : index
    %c0_180 = arith.constant 0 : index
    %189 = vector.load %arg6[%c1_178, %c0_179, %c0_180] : memref<2x1x32xf32, #tpu.memory_space<vmem>>, vector<1x1x32xf32>
    %190 = vector.shape_cast %189 : vector<1x1x32xf32> to vector<1x32xf32>
    %191 = vector.shape_cast %190 : vector<1x32xf32> to vector<1x1x32xf32>
    %192 = vector.broadcast %191 : vector<1x1x32xf32> to vector<8x16x32xf32>
    %193 = arith.addf %188, %192 : vector<8x16x32xf32>
    %194 = arith.mulf %115, %115 : vector<8x16x32xf32>
    %195 = arith.mulf %115, %194 : vector<8x16x32xf32>
    %cst_181 = arith.constant 4.471500e-02 : f32
    %196 = vector.broadcast %cst_181 : f32 to vector<8x16x32xf32>
    %197 = arith.mulf %196, %195 : vector<8x16x32xf32>
    %198 = arith.addf %115, %197 : vector<8x16x32xf32>
    %cst_182 = arith.constant 0.797884583 : f32
    %199 = vector.broadcast %cst_182 : f32 to vector<8x16x32xf32>
    %200 = arith.mulf %199, %198 : vector<8x16x32xf32>
    %201 = math.tanh %200 : vector<8x16x32xf32>
    %cst_183 = arith.constant 1.000000e+00 : f32
    %202 = vector.broadcast %cst_183 : f32 to vector<8x16x32xf32>
    %203 = arith.addf %202, %201 : vector<8x16x32xf32>
    %cst_184 = arith.constant 5.000000e-01 : f32
    %204 = vector.broadcast %cst_184 : f32 to vector<8x16x32xf32>
    %205 = arith.mulf %204, %203 : vector<8x16x32xf32>
    %206 = arith.mulf %115, %205 : vector<8x16x32xf32>
    %207 = arith.mulf %206, %193 : vector<8x16x32xf32>
    %208 = vector.shape_cast %207 : vector<8x16x32xf32> to vector<128x32xf32>
    %c0_185 = arith.constant 0 : index
    %c0_186 = arith.constant 0 : index
    %209 = vector.load %arg7[%c0_185, %c0_186] : memref<32x16xf32, #tpu.memory_space<vmem>>, vector<32x16xf32>
    %cst_187 = arith.constant dense<0.000000e+00> : vector<128x16xf32>
    %210 = tpu.matmul %208, %209, %cst_187 {dimension_numbers = #tpu.dot_dimension_numbers<[1], [0], [0], [1], [0, 0, 1, 1], [], []>} : vector<128x32xf32>, vector<32x16xf32>, vector<128x16xf32> -> vector<128x16xf32>
    %c0_188 = arith.constant 0 : index
    %c0_189 = arith.constant 0 : index
    %211 = vector.load %arg8[%c0_188, %c0_189] : memref<1x16xf32, #tpu.memory_space<vmem>>, vector<1x16xf32>
    %212 = vector.broadcast %211 : vector<1x16xf32> to vector<128x16xf32>
    %213 = arith.addf %210, %212 : vector<128x16xf32>
    %214 = vector.shape_cast %213 : vector<128x16xf32> to vector<8x16x16xf32>
    %c0_190 = arith.constant 0 : index
    %c0_191 = arith.constant 0 : index
    %c0_192 = arith.constant 0 : index
    %c0_193 = arith.constant 0 : index
    %215 = vector.load %arg9[%c0_190, %c0_191, %c0_192, %c0_193] : memref<1x8x16x16xf32, #tpu.memory_space<vmem>>, vector<1x8x16x16xf32>
    %216 = vector.shape_cast %215 : vector<1x8x16x16xf32> to vector<8x16x16xf32>
    %217 = vector.shape_cast %214 : vector<8x16x16xf32> to vector<1x8x16x16xf32>
    tpu.vector_store %arg9[%c0_190, %c0_191, %c0_192, %c0_193], %217 {strides = array<i32>} : memref<1x8x16x16xf32, #tpu.memory_space<vmem>>, vector<1x8x16x16xf32>,
    return
  }
  func.func @transform_0(%arg0: i32, %arg1: i32) -> (i32, i32, i32, i32) {
    %c0_i32 = arith.constant 0 : i32
    %c0_i32_0 = arith.constant 0 : i32
    %c0_i32_1 = arith.constant 0 : i32
    %c0_i32_2 = arith.constant 0 : i32
    return %arg0, %c0_i32, %c0_i32_0, %c0_i32_1 : i32, i32, i32, i32
  }
  func.func @transform_1(%arg0: i32, %arg1: i32) -> (i32, i32, i32) {
    %c0_i32 = arith.constant 0 : i32
    %c0_i32_0 = arith.constant 0 : i32
    %c0_i32_1 = arith.constant 0 : i32
    %c0_i32_2 = arith.constant 0 : i32
    return %c0_i32, %c0_i32_0, %c0_i32_1 : i32, i32, i32
  }
  func.func @transform_2(%arg0: i32, %arg1: i32) -> (i32, i32, i32) {
    %c0_i32 = arith.constant 0 : i32
    %c0_i32_0 = arith.constant 0 : i32
    %c0_i32_1 = arith.constant 0 : i32
    %c0_i32_2 = arith.constant 0 : i32
    return %c0_i32, %c0_i32_0, %c0_i32_1 : i32, i32, i32
  }
  func.func @transform_3(%arg0: i32, %arg1: i32) -> (i32, i32, i32, i32) {
    %c0_i32 = arith.constant 0 : i32
    %c0_i32_0 = arith.constant 0 : i32
    %c0_i32_1 = arith.constant 0 : i32
    %c0_i32_2 = arith.constant 0 : i32
    %c0_i32_3 = arith.constant 0 : i32
    return %c0_i32, %c0_i32_0, %c0_i32_1, %c0_i32_2 : i32, i32, i32, i32
  }
  func.func @transform_4(%arg0: i32, %arg1: i32) -> (i32, i32, i32) {
    %c0_i32 = arith.constant 0 : i32
    %c0_i32_0 = arith.constant 0 : i32
    %c0_i32_1 = arith.constant 0 : i32
    %c0_i32_2 = arith.constant 0 : i32
    return %c0_i32, %c0_i32_0, %c0_i32_1 : i32, i32, i32
  }
  func.func @transform_5(%arg0: i32, %arg1: i32) -> (i32, i32) {
    %c0_i32 = arith.constant 0 : i32
    %c0_i32_0 = arith.constant 0 : i32
    %c0_i32_1 = arith.constant 0 : i32
    return %c0_i32, %c0_i32_0 : i32, i32
  }
  func.func @transform_6(%arg0: i32, %arg1: i32) -> (i32, i32) {
    %c0_i32 = arith.constant 0 : i32
    %c0_i32_0 = arith.constant 0 : i32
    %c0_i32_1 = arith.constant 0 : i32
    return %c0_i32, %c0_i32_0 : i32, i32
  }
  func.func @transform_7(%arg0: i32, %arg1: i32) -> (i32, i32, i32, i32) {
    %c0_i32 = arith.constant 0 : i32
    %c0_i32_0 = arith.constant 0 : i32
    %c0_i32_1 = arith.constant 0 : i32
    return %arg0, %arg1, %c0_i32, %c0_i32_0 : i32, i32, i32, i32
  }
}

</mosaic_0001>

<bundles_post_ra>
// kernel: tpu_custom_call.1
= control target key start
LH: loop header
LB: loop body
LE: loop exit
PB: predicated region body
PF: predicated region fallthrough
CT: control target
= control target key end

     0   :  { %s4359_s0 = inlined_call_operand.vmem [shape: f32[2,18,16,16], index: 0, kind: input, shape index: {}]   ;;  %s4360_s1 = inlined_call_operand.vmem [shape: f32[2,16,32], index: 1, kind: input, shape index: {}]   ;;  %s4361_s2 = inlined_call_operand.vmem [shape: f32[2,1,32], index: 2, kind: input, shape index: {}]   ;;  %s4362_s3 = inlined_call_operand.vmem [shape: f32[2,3,3,32], index: 3, kind: input, shape index: {}]   ;;  %s4363_s4 = inlined_call_operand.vmem [shape: f32[2,1,32], index: 4, kind: input, shape index: {}]   ;;  %s4364_s5 = inlined_call_operand.vmem [shape: f32[32,16], index: 5, kind: input, shape index: {}]   ;;  %s4365_s6 = inlined_call_operand.vmem [shape: f32[1,16], index: 6, kind: input, shape index: {}]   ;;  %s4366_s7 = inlined_call_operand.hbm [shape: f32[2,16,16,16], index: 7, kind: output, shape index: {}]  }
   0x1   :  { %4395 = sst [smem:[#allocation16_spill]] %s4359_s0 }
   0x2   :  { %12 = vsyncpa [#allocation4], 0 }
   0x3   :  { %14 = vsyncpa [#allocation4 + $0x1], 0  ;;  %s2881_s24 = smov 0   ;;  %s2883_s25 = smov 0  }
   0x4   :  { %s2885_s26 = smov 0   ;;  %s2887_s27 = smov 0  }
   0x5   :  { %s2889_s28 = smov 0   ;;  %s2891_s29 = smov 0  }
   0x6   :  { %s2893_s30 = smov 0   ;;  %s2895_s8 = smov 0  }
   0x7 LB: > { %s2310_s9 = sadd.s32 4294967295, %s2833_s8   ;;  %s2311_s10 = sadd.s32 4294967294, %s2833_s8   ;;  %s2833_s8 = sphi %s2895_s8, %s20_s8   ;;  %s2829_s30 = sphi %s2893_s30, %s4439_s30   ;;  %s2825_s29 = sphi %s2891_s29, %s4438_s29   ;;  %s2821_s28 = sphi %s2889_s28, %s4437_s28   ;;  %s2817_s27 = sphi %s2887_s27, %s4436_s27   ;;  %s2813_s26 = sphi %s2885_s26, %s4435_s26   ;;  %s2809_s25 = sphi %s2883_s25, %s4434_s25   ;;  %s2805_s24 = sphi %s2881_s24, %s4433_s24  }
   0x8   : > { %s29_s11 = sadd.s32 1, %s2825_s29  ;;  %s32_s12 = sadd.s32 1, %s2829_s30 }
   0x9   : > { %p30_p0 = scmp.ge.s32.totalorder %s29_s11, 2  ;;  %p203_p1 = scmp.ne.s32.totalorder %s2813_s26, %s2809_s25 }
   0xa   : > { %p204_p2 = scmp.eq.s32.totalorder %s2310_s9, 3  ;;  %p209_p5 = scmp.ne.s32.totalorder %s2809_s25, %s2805_s24 }
   0xb   : > { %s4441_s11 = smov (%p30_p0, %s29_s11), 0  ;;  %s4443_s12 = smov (!%p30_p0, %s32_s12), %s2829_s30 }
   0xc   : > { %s189_s13 = ssub.s32 %s2825_s29, %s4441_s11  ;;  %p2932_p3 = por %p204_p2, %p203_p1 }
   0xd   : > { %p34_p4 = scmp.ge.s32.totalorder %s4443_s12, 2  ;;  %p210_p6 = scmp.eq.s32.totalorder %s2311_s10, 3 }
   0xe   : > { %p2314_p7 = scmp.ge.s32.totalorder %s2833_s8, 1  ;;  %p254_p9 = scmp.lt.s32.totalorder %s2833_s8, 5 }
   0xf   : > { %s4445_s12 = smov (%p34_p4, %s4443_s12), 0  ;;  %p2941_p8 = por %p210_p6, %p209_p5 }
  0x10   : > { %s188_s16 = ssub.s32 %s2829_s30, %s4445_s12  ;;  %s193_s17 = sadd.s32 1, %s2813_s26 }
  0x11   : > { %s190_s18 = sor.u32 %s189_s13, %s188_s16  ;;  %p255_p10 = pnand %p2314_p7, %p254_p9 }
  0x12   : > { %p191_p11 = scmp.eq.s32.totalorder %s190_s18, 0 }
  0x13   : > { %258 = sbr.rel (%p255_p10) target bundleno = 761 (0x2f9), region = 48 }
  0x14   : > { %s2950_s19 = scalar_select %p191_p11, %s2813_s26, %s193_s17  }
  0x1a   : > { %v356_v0 = vld [vmem:[%s4360_s1] sm:$0xff]  ;;  %v357_v1 = vld [vmem:[%s4360_s1 + $0x8] sm:$0xff]  ;;  %p286_p12 = scmp.lt.s32.totalorder %s2821_s28, 1  ;;  %v2340_v2 = vld [vmem:[%s4360_s1 + $0x10] sm:$0xff]  ;;  %s4367_s17 = sand.u32 1, %s2809_s25   ;;  %vm292_vm0 = vcmask 261120  }
  0x1b   : > { %v2592_v3 = vpack.c.bf16 %v357_v1, %v356_v0  ;;  %v2341_v4 = vld [vmem:[%s4360_s1 + $0x18] sm:$0xff]  ;;  %v2835_v6 = vmov 0.0   ;;  %s2426_s20 = sshll.u32 %s2817_s27, 7  ;;  %s3012_s21 = sshll.u32 %s4367_s17, 7  ;;  %vm365_vm1 = vcmask 130048  }
  0x1c   : > { %s2967_s18 = scalar_select %p286_p12, %s2821_s28, 1  ;;  %v2596_v5 = vpack.c.bf16 %v2341_v4, %v2340_v2  ;;  %293 = vst.msk [vmem:[#allocation2] sm:$0xff] %vm292_vm0, %v2835_v6  ;;  %294 = vst.msk [vmem:[#allocation2 + $0x20] sm:$0xff] %vm292_vm0, %v2835_v6  ;;  %v3083_v27 = vld [vmem:[%s4361_s2] ss:$0 sm:$0xff] }
  0x1d   : > { %295 = vst.msk [vmem:[#allocation2 + $0x40] sm:$0xff] %vm292_vm0, %v2835_v6  ;;  %296 = vst.msk [vmem:[#allocation2 + $0x60] sm:$0xff] %vm292_vm0, %v2835_v6  ;;  %2608 = vmatprep.subr.bf16.mxu1 %v2592_v3  ;;  %2593 = vmatprep.subr.bf16.mxu0 %v2592_v3  ;;  %s4398_s0 = sld [smem:[#allocation16_spill]]  ;;  %v3112_v56 = vld [vmem:[%s4361_s2 + $0x1] ss:$0 sm:$0xff]  ;;  %s3171_s23 = scalar_lea.vmem [#allocation3], %s3012_s21 }
  0x1e   : > { %297 = vst.msk [vmem:[#allocation2 + $0x80] sm:$0xff] %vm292_vm0, %v2835_v6  ;;  %298 = vst.msk [vmem:[#allocation2 + $0xa0] sm:$0xff] %vm292_vm0, %v2835_v6  ;;  %2609 = vmatpush3.bf16.msra.mxu1 %v2592_v3  ;;  %s2610_s22 = smul.u32 288, %s2967_s18  ;;  %2595 = vmatpush3.bf16.msra.mxu0 %v2592_v3  ;;  %p2364_p13 = scmp.ne.s32.totalorder %s2817_s27, 0 }
  0x1f   : > { %299 = vst.msk [vmem:[#allocation2 + $0xc0] sm:$0xff] %vm292_vm0, %v2835_v6  ;;  %300 = vst.msk [vmem:[#allocation2 + $0xe0] sm:$0xff] %vm292_vm0, %v2835_v6  ;;  %2597 = vmatprep.subr.bf16.mxu1 %v2596_v5 }
  0x20   : > { %301 = vst.msk [vmem:[#allocation2 + $0x100] sm:$0xff] %vm292_vm0, %v2835_v6  ;;  %302 = vst.msk [vmem:[#allocation2 + $0x120] sm:$0xff] %vm292_vm0, %v2835_v6 }
  0x21   : > { %303 = vst.msk [vmem:[#allocation2 + $0x140] sm:$0xff] %vm292_vm0, %v2835_v6  ;;  %304 = vst.msk [vmem:[#allocation2 + $0x160] sm:$0xff] %vm292_vm0, %v2835_v6 }
  0x22   : > { %305 = vst.msk [vmem:[#allocation2 + $0x180] sm:$0xff] %vm292_vm0, %v2835_v6  ;;  %306 = vst.msk [vmem:[#allocation2 + $0x1a0] sm:$0xff] %vm292_vm0, %v2835_v6 }
  0x23   : > { %307 = vst.msk [vmem:[#allocation2 + $0x1c0] sm:$0xff] %vm292_vm0, %v2835_v6  ;;  %308 = vst.msk [vmem:[#allocation2 + $0x1e0] sm:$0xff] %vm292_vm0, %v2835_v6  ;;  %s290_s10 = scalar_lea.vmem %s4398_s0, %s2610_s22 }
  0x24   : > { %309 = vst.msk [vmem:[#allocation2 + $0x200] sm:$0xff] %vm292_vm0, %v2835_v6  ;;  %310 = vst.msk [vmem:[#allocation2 + $0x220] sm:$0xff] %vm292_vm0, %v2835_v6  ;;  %s3018_s13 = scalar_lea.vmem %s290_s10, %s2426_s20 }
  0x25   : > { %311 = vst.msk [vmem:[#allocation2 + $0x240] sm:$0xff] %vm292_vm0, %v2835_v6  ;;  %312 = vst.msk [vmem:[#allocation2 + $0x260] sm:$0xff] %vm292_vm0, %v2835_v6  ;;  %v348_v7 = vld [vmem:[%s3018_s13 + $0x60] sm:$0xff]  ;;  %v349_v8 = vld [vmem:[%s3018_s13 + $0x68] sm:$0xff] }
  0x26   : > { %313 = vst.msk [vmem:[#allocation2 + $0x18] sm:$0xff] %vm292_vm0, %v2835_v6  ;;  %314 = vst.msk [vmem:[#allocation2 + $0x38] sm:$0xff] %vm292_vm0, %v2835_v6  ;;  %v350_v9 = vld [vmem:[%s3018_s13 + $0x70] sm:$0xff]  ;;  %2514 = vmatprep.mubr.msk.f32.mxu1 %vm365_vm1, %v348_v7  ;;  %v351_v10 = vld [vmem:[%s3018_s13 + $0x78] sm:$0xff] }
  0x27   : > { %315 = vst.msk [vmem:[#allocation2 + $0x58] sm:$0xff] %vm292_vm0, %v2835_v6  ;;  %316 = vst.msk [vmem:[#allocation2 + $0x78] sm:$0xff] %vm292_vm0, %v2835_v6  ;;  %2515 = vmatmul.mubr.msk.f32.vlgmr.msra.gmra.mrb[0].mxu1 %vm365_vm1, %v349_v8  ;;  %v336_v11 = vld [vmem:[%s3018_s13] sm:$0xff]  ;;  %v337_v13 = vld [vmem:[%s3018_s13 + $0x8] sm:$0xff] }
  0x28   : > { %317 = vst.msk [vmem:[#allocation2 + $0x98] sm:$0xff] %vm292_vm0, %v2835_v6  ;;  %318 = vst.msk [vmem:[#allocation2 + $0xb8] sm:$0xff] %vm292_vm0, %v2835_v6  ;;  %2599 = vmatpush3.bf16.msra.mxu1 %v2596_v5  ;;  %2517 = vmatprep.mubr.msk.f32.mxu1 %vm365_vm1, %v350_v9  ;;  %v352_v12 = vld [vmem:[%s3018_s13 + $0x80] sm:$0xff]  ;;  %v338_v14 = vld [vmem:[%s3018_s13 + $0x10] sm:$0xff] }
  0x29   : > { %319 = vst.msk [vmem:[#allocation2 + $0xd8] sm:$0xff] %vm292_vm0, %v2835_v6  ;;  %320 = vst.msk [vmem:[#allocation2 + $0xf8] sm:$0xff] %vm292_vm0, %v2835_v6  ;;  %2496 = vmatprep.mubr.msk.f32.mxu0 %vm365_vm1, %v336_v11  ;;  %v353_v15 = vld [vmem:[%s3018_s13 + $0x88] sm:$0xff]  ;;  %v354_v16 = vld [vmem:[%s3018_s13 + $0x90] sm:$0xff] }
  0x2a   : > { %321 = vst.msk [vmem:[#allocation2 + $0x118] sm:$0xff] %vm292_vm0, %v2835_v6  ;;  %322 = vst.msk [vmem:[#allocation2 + $0x138] sm:$0xff] %vm292_vm0, %v2835_v6  ;;  %2497 = vmatmul.mubr.msk.f32.vlgmr.msra.gmra.mrb[0].mxu0 %vm365_vm1, %v337_v13  ;;  %v339_v17 = vld [vmem:[%s3018_s13 + $0x18] sm:$0xff]  ;;  %v340_v18 = vld [vmem:[%s3018_s13 + $0x20] sm:$0xff] }
  0x2b   : > { %323 = vst.msk [vmem:[#allocation2 + $0x158] sm:$0xff] %vm292_vm0, %v2835_v6  ;;  %324 = vst.msk [vmem:[#allocation2 + $0x178] sm:$0xff] %vm292_vm0, %v2835_v6  ;;  %2518 = vmatmul.mubr.msk.f32.gmra.mrb[2].mxu1 %vm365_vm1, %v351_v10  ;;  %2499 = vmatprep.mubr.msk.f32.mxu0 %vm365_vm1, %v338_v14  ;;  %v355_v19 = vld [vmem:[%s3018_s13 + $0x98] sm:$0xff]  ;;  %v341_v20 = vld [vmem:[%s3018_s13 + $0x28] sm:$0xff] }
  0x2c   : > { %325 = vst.msk [vmem:[#allocation2 + $0x198] sm:$0xff] %vm292_vm0, %v2835_v6  ;;  %326 = vst.msk [vmem:[#allocation2 + $0x1b8] sm:$0xff] %vm292_vm0, %v2835_v6  ;;  %2520 = vmatprep.mubr.msk.f32.mxu1 %vm365_vm1, %v352_v12  ;;  %v342_v21 = vld [vmem:[%s3018_s13 + $0x30] sm:$0xff]  ;;  %v343_v22 = vld [vmem:[%s3018_s13 + $0x38] sm:$0xff] }
  0x2d   : > { %327 = vst.msk [vmem:[#allocation2 + $0x1d8] sm:$0xff] %vm292_vm0, %v2835_v6  ;;  %328 = vst.msk [vmem:[#allocation2 + $0x1f8] sm:$0xff] %vm292_vm0, %v2835_v6  ;;  %v344_v23 = vld [vmem:[%s3018_s13 + $0x40] sm:$0xff]  ;;  %v345_v24 = vld [vmem:[%s3018_s13 + $0x48] sm:$0xff] }
  0x2e   : > { %329 = vst.msk [vmem:[#allocation2 + $0x218] sm:$0xff] %vm292_vm0, %v2835_v6  ;;  %330 = vst.msk [vmem:[#allocation2 + $0x238] sm:$0xff] %vm292_vm0, %v2835_v6  ;;  %2500 = vmatmul.mubr.msk.f32.gmra.mrb[2].mxu0 %vm365_vm1, %v339_v17  ;;  %v346_v25 = vld [vmem:[%s3018_s13 + $0x50] sm:$0xff]  ;;  %v347_v26 = vld [vmem:[%s3018_s13 + $0x58] sm:$0xff] }
  0x2f   : > { %331 = vst.msk [vmem:[#allocation2 + $0x258] sm:$0xff] %vm292_vm0, %v2835_v6  ;;  %332 = vst.msk [vmem:[#allocation2 + $0x278] sm:$0xff] %vm292_vm0, %v2835_v6  ;;  %2521 = vmatmul.mubr.msk.f32.gmra.mrb[4].mxu1 %vm365_vm1, %v353_v15  ;;  %2502 = vmatprep.mubr.msk.f32.mxu0 %vm365_vm1, %v340_v18 }
  0x30   : > { %2523 = vmatprep.mubr.msk.f32.mxu1 %vm365_vm1, %v354_v16 }
  0x32   : > { %2503 = vmatmul.mubr.msk.f32.gmra.mrb[4].mxu0 %vm365_vm1, %v341_v20 }
  0x33   : > { %2524 = vmatmul.mubr.msk.f32.gmra.mrb[6].mxu1 %vm365_vm1, %v355_v19  ;;  %2505 = vmatprep.mubr.msk.f32.mxu0 %vm365_vm1, %v342_v21 }
  0x34   : > { %2530 = vmatprep.mubr.msk.f32.mxu1 %vm365_vm1, %v336_v11 }
  0x36   : > { %2506 = vmatmul.mubr.msk.f32.gmra.mrb[6].mxu0 %vm365_vm1, %v343_v22 }
  0x37   : > { %2531 = vmatmul.mubr.msk.f32.vlgmr.msra.gmra.mrb[8].mxu1 %vm365_vm1, %v337_v13  ;;  %2508 = vmatprep.mubr.msk.f32.mxu0 %vm365_vm1, %v344_v23 }
  0x38   : > { %2533 = vmatprep.mubr.msk.f32.mxu1 %vm365_vm1, %v338_v14 }
  0x3a   : > { %2509 = vmatmul.mubr.msk.f32.gmra.mrb[8].mxu0 %vm365_vm1, %v345_v24 }
  0x3b   : > { %2534 = vmatmul.mubr.msk.f32.gmra.mrb[10].mxu1 %vm365_vm1, %v339_v17  ;;  %2511 = vmatprep.mubr.msk.f32.mxu0 %vm365_vm1, %v346_v25 }
  0x3c   : > { %2536 = vmatprep.mubr.msk.f32.mxu1 %vm365_vm1, %v340_v18 }
  0x3e   : > { %2512 = vmatmul.mubr.msk.f32.gmra.mrb[10].mxu0 %vm365_vm1, %v347_v26 }
  0x3f   : > { %2537 = vmatmul.mubr.msk.f32.gmra.mrb[12].mxu1 %vm365_vm1, %v341_v20 }
  0x40   : > { %2539 = vmatprep.mubr.msk.f32.mxu1 %vm365_vm1, %v342_v21 }
  0x43   : > { %2540 = vmatmul.mubr.msk.f32.gmra.mrb[14].mxu1 %vm365_vm1, %v343_v22 }
  0x44   : > { %2542 = vmatprep.mubr.msk.f32.mxu1 %vm365_vm1, %v344_v23 }
  0x47   : > { %2543 = vmatmul.mubr.msk.f32.gmra.mrb[16].mxu1 %vm365_vm1, %v345_v24 }
  0x48   : > { %2545 = vmatprep.mubr.msk.f32.mxu1 %vm365_vm1, %v346_v25 }
  0x4b   : > { %2546 = vmatmul.mubr.msk.f32.gmra.mrb[18].mxu1 %vm365_vm1, %v347_v26 }
  0x4c   : > { %2548 = vmatprep.mubr.msk.f32.mxu1 %vm365_vm1, %v348_v7 }
  0x4f   : > { %2549 = vmatmul.mubr.msk.f32.gmra.mrb[20].mxu1 %vm365_vm1, %v349_v8 }
  0x50   : > { %2551 = vmatprep.mubr.msk.f32.mxu1 %vm365_vm1, %v350_v9 }
  0x53   : > { %2552 = vmatmul.mubr.msk.f32.gmra.mrb[22].mxu1 %vm365_vm1, %v351_v10 }
  0x54   : > { %2554 = vmatprep.mubr.msk.f32.mxu1 %vm365_vm1, %v352_v12 }
  0x57   : > { %2555 = vmatmul.mubr.msk.f32.gmra.mrb[24].mxu1 %vm365_vm1, %v353_v15 }
  0x58   : > { %2557 = vmatprep.mubr.msk.f32.mxu1 %vm365_vm1, %v354_v16 }
  0x5b   : > { %2558 = vmatmul.mubr.msk.f32.gmra.mrb[26].mxu1 %vm365_vm1, %v355_v19 }
  0xfa   : > { %v2516_v28 = vpop.f32.mrb[0].mxu1 }
  0xfb   : > { %v558_v29 = vadd.f32 %v2516_v28, %v3083_v27  ;;  %v552_v30 = vpop.f32.mrb[1].mxu1 }
  0xfc   : > { %v553_v31 = vadd.f32 %v3083_v27, %v552_v30 }
  0xfd   : > { %604 = vst.msk [vmem:[#allocation2 + $0xd0] sm:$0xff] %vm292_vm0, %v558_v29  ;;  %v2498_v32 = vpop.f32.mrb[0].mxu0 }
  0xfe   : > { %603 = vst.msk [vmem:[#allocation2 + $0xc8] sm:$0xff] %vm292_vm0, %v553_v31  ;;  %v2519_v33 = vpop.f32.mrb[2].mxu1  ;;  %v498_v34 = vadd.f32 %v2498_v32, %v3083_v27  ;;  %v492_v35 = vpop.f32.mrb[1].mxu0 }
  0xff   : > { %v568_v36 = vadd.f32 %v2519_v33, %v3083_v27  ;;  %v562_v37 = vpop.f32.mrb[3].mxu1  ;;  %v493_v38 = vadd.f32 %v3083_v27, %v492_v35 }
 0x100   : > { %v563_v39 = vadd.f32 %v3083_v27, %v562_v37  ;;  %592 = vst.msk [vmem:[#allocation2 + $0x10] sm:$0xff] %vm292_vm0, %v498_v34 }
 0x101   : > { %606 = vst.msk [vmem:[#allocation2 + $0xf0] sm:$0xff] %vm292_vm0, %v568_v36  ;;  %591 = vst.msk [vmem:[#allocation2 + $0x8] sm:$0xff] %vm292_vm0, %v493_v38  ;;  %v2501_v40 = vpop.f32.mrb[2].mxu0 }
 0x102   : > { %605 = vst.msk [vmem:[#allocation2 + $0xe8] sm:$0xff] %vm292_vm0, %v563_v39  ;;  %v2522_v41 = vpop.f32.mrb[4].mxu1  ;;  %v508_v42 = vadd.f32 %v2501_v40, %v3083_v27  ;;  %v502_v43 = vpop.f32.mrb[3].mxu0 }
 0x103   : > { %v578_v44 = vadd.f32 %v2522_v41, %v3083_v27  ;;  %v572_v45 = vpop.f32.mrb[5].mxu1  ;;  %v503_v46 = vadd.f32 %v3083_v27, %v502_v43 }
 0x104   : > { %v573_v47 = vadd.f32 %v3083_v27, %v572_v45  ;;  %594 = vst.msk [vmem:[#allocation2 + $0x30] sm:$0xff] %vm292_vm0, %v508_v42  ;;  %v2836_v45 = vmov (!%p2364_p13), 0.0  }
 0x105   : > { %608 = vst.msk [vmem:[#allocation2 + $0x110] sm:$0xff] %vm292_vm0, %v578_v44  ;;  %593 = vst.msk [vmem:[#allocation2 + $0x28] sm:$0xff] %vm292_vm0, %v503_v46  ;;  %v2504_v48 = vpop.f32.mrb[4].mxu0 }
 0x106   : > { %607 = vst.msk [vmem:[#allocation2 + $0x108] sm:$0xff] %vm292_vm0, %v573_v47  ;;  %v2525_v49 = vpop.f32.mrb[6].mxu1  ;;  %v518_v50 = vadd.f32 %v2504_v48, %v3083_v27  ;;  %v512_v51 = vpop.f32.mrb[5].mxu0  ;;  %812 = vst.msk [vmem:[#allocation2 + $0x8] sm:$0xff] (!%p2364_p13), %vm292_vm0, %v2836_v45 }
 0x107   : > { %v588_v52 = vadd.f32 %v2525_v49, %v3083_v27  ;;  %v582_v53 = vpop.f32.mrb[7].mxu1  ;;  %v513_v54 = vadd.f32 %v3083_v27, %v512_v51  ;;  %813 = vst.msk [vmem:[#allocation2 + $0x10] sm:$0xff] (!%p2364_p13), %vm292_vm0, %v2836_v45 }
 0x108   : > { %v583_v55 = vadd.f32 %v3083_v27, %v582_v53  ;;  %596 = vst.msk [vmem:[#allocation2 + $0x50] sm:$0xff] %vm292_vm0, %v518_v50 }
 0x109   : > { %610 = vst.msk [vmem:[#allocation2 + $0x130] sm:$0xff] %vm292_vm0, %v588_v52  ;;  %595 = vst.msk [vmem:[#allocation2 + $0x48] sm:$0xff] %vm292_vm0, %v513_v54  ;;  %v2507_v57 = vpop.f32.mrb[6].mxu0 }
 0x10a   : > { %609 = vst.msk [vmem:[#allocation2 + $0x128] sm:$0xff] %vm292_vm0, %v583_v55  ;;  %v2532_v58 = vpop.f32.mrb[8].mxu1  ;;  %v528_v59 = vadd.f32 %v2507_v57, %v3083_v27  ;;  %v522_v60 = vpop.f32.mrb[7].mxu0 }
 0x10b   : > { %v694_v61 = vadd.f32 %v2532_v58, %v3112_v56  ;;  %v688_v62 = vpop.f32.mrb[9].mxu1  ;;  %v523_v63 = vadd.f32 %v3083_v27, %v522_v60 }
 0x10c   : > { %v689_v0 = vadd.f32 %v3112_v56, %v688_v62  ;;  %598 = vst.msk [vmem:[#allocation2 + $0x70] sm:$0xff] %vm292_vm0, %v528_v59 }
 0x10d   : > { %789 = vst.msk [vmem:[#allocation2 + $0x150] sm:$0xff] %vm292_vm0, %v694_v61  ;;  %597 = vst.msk [vmem:[#allocation2 + $0x68] sm:$0xff] %vm292_vm0, %v523_v63  ;;  %v2510_v1 = vpop.f32.mrb[8].mxu0 }
 0x10e   : > { %788 = vst.msk [vmem:[#allocation2 + $0x148] sm:$0xff] %vm292_vm0, %v689_v0  ;;  %v2535_v2 = vpop.f32.mrb[10].mxu1  ;;  %v538_v3 = vadd.f32 %v2510_v1, %v3083_v27  ;;  %v532_v4 = vpop.f32.mrb[9].mxu0  ;;  %815 = vst.msk [vmem:[#allocation2 + $0x150] sm:$0xff] (!%p2364_p13), %vm292_vm0, %v2836_v45 }
 0x10f   : > { %v704_v5 = vadd.f32 %v2535_v2, %v3112_v56  ;;  %v698_v6 = vpop.f32.mrb[11].mxu1  ;;  %v533_v7 = vadd.f32 %v3083_v27, %v532_v4  ;;  %814 = vst.msk [vmem:[#allocation2 + $0x148] sm:$0xff] (!%p2364_p13), %vm292_vm0, %v2836_v45 }
 0x110   : > { %v699_v8 = vadd.f32 %v3112_v56, %v698_v6  ;;  %600 = vst.msk [vmem:[#allocation2 + $0x90] sm:$0xff] %vm292_vm0, %v538_v3 }
 0x111   : > { %791 = vst.msk [vmem:[#allocation2 + $0x170] sm:$0xff] %vm292_vm0, %v704_v5  ;;  %599 = vst.msk [vmem:[#allocation2 + $0x88] sm:$0xff] %vm292_vm0, %v533_v7  ;;  %v2513_v9 = vpop.f32.mrb[10].mxu0 }
 0x112   : > { %790 = vst.msk [vmem:[#allocation2 + $0x168] sm:$0xff] %vm292_vm0, %v699_v8  ;;  %v2538_v10 = vpop.f32.mrb[12].mxu1  ;;  %v548_v11 = vadd.f32 %v2513_v9, %v3083_v27  ;;  %v542_v12 = vpop.f32.mrb[11].mxu0 }
 0x113   : > { %v714_v13 = vadd.f32 %v2538_v10, %v3112_v56  ;;  %v708_v14 = vpop.f32.mrb[13].mxu1  ;;  %v543_v15 = vadd.f32 %v3083_v27, %v542_v12 }
 0x114   : > { %v709_v16 = vadd.f32 %v3112_v56, %v708_v14  ;;  %602 = vst.msk [vmem:[#allocation2 + $0xb0] sm:$0xff] %vm292_vm0, %v548_v11 }
 0x115   : > { %793 = vst.msk [vmem:[#allocation2 + $0x190] sm:$0xff] %vm292_vm0, %v714_v13  ;;  %601 = vst.msk [vmem:[#allocation2 + $0xa8] sm:$0xff] %vm292_vm0, %v543_v15 }
 0x116   : > { %792 = vst.msk [vmem:[#allocation2 + $0x188] sm:$0xff] %vm292_vm0, %v709_v16  ;;  %v2541_v17 = vpop.f32.mrb[14].mxu1 }
 0x117   : > { %v724_v18 = vadd.f32 %v2541_v17, %v3112_v56  ;;  %v718_v19 = vpop.f32.mrb[15].mxu1 }
 0x118   : > { %v719_v20 = vadd.f32 %v3112_v56, %v718_v19 }
 0x119   : > { %795 = vst.msk [vmem:[#allocation2 + $0x1b0] sm:$0xff] %vm292_vm0, %v724_v18 }
 0x11a   : > { %794 = vst.msk [vmem:[#allocation2 + $0x1a8] sm:$0xff] %vm292_vm0, %v719_v20  ;;  %v2544_v21 = vpop.f32.mrb[16].mxu1 }
 0x11b   : > { %v734_v22 = vadd.f32 %v2544_v21, %v3112_v56  ;;  %v728_v23 = vpop.f32.mrb[17].mxu1 }
 0x11c   : > { %v729_v24 = vadd.f32 %v3112_v56, %v728_v23 }
 0x11d   : > { %797 = vst.msk [vmem:[#allocation2 + $0x1d0] sm:$0xff] %vm292_vm0, %v734_v22 }
 0x11e   : > { %796 = vst.msk [vmem:[#allocation2 + $0x1c8] sm:$0xff] %vm292_vm0, %v729_v24  ;;  %v2547_v25 = vpop.f32.mrb[18].mxu1 }
 0x11f   : > { %v744_v26 = vadd.f32 %v2547_v25, %v3112_v56  ;;  %v738_v27 = vpop.f32.mrb[19].mxu1 }
 0x120   : > { %v739_v28 = vadd.f32 %v3112_v56, %v738_v27 }
 0x121   : > { %799 = vst.msk [vmem:[#allocation2 + $0x1f0] sm:$0xff] %vm292_vm0, %v744_v26 }
 0x122   : > { %798 = vst.msk [vmem:[#allocation2 + $0x1e8] sm:$0xff] %vm292_vm0, %v739_v28  ;;  %v2550_v29 = vpop.f32.mrb[20].mxu1 }
 0x123   : > { %v754_v30 = vadd.f32 %v2550_v29, %v3112_v56  ;;  %v748_v31 = vpop.f32.mrb[21].mxu1 }
 0x124   : > { %v749_v32 = vadd.f32 %v3112_v56, %v748_v31 }
 0x125   : > { %801 = vst.msk [vmem:[#allocation2 + $0x210] sm:$0xff] %vm292_vm0, %v754_v30 }
 0x126   : > { %800 = vst.msk [vmem:[#allocation2 + $0x208] sm:$0xff] %vm292_vm0, %v749_v32  ;;  %v2553_v33 = vpop.f32.mrb[22].mxu1 }
 0x127   : > { %v764_v34 = vadd.f32 %v2553_v33, %v3112_v56  ;;  %v758_v35 = vpop.f32.mrb[23].mxu1 }
 0x128   : > { %v759_v36 = vadd.f32 %v3112_v56, %v758_v35 }
 0x129   : > { %803 = vst.msk [vmem:[#allocation2 + $0x230] sm:$0xff] %vm292_vm0, %v764_v34 }
 0x12a   : > { %802 = vst.msk [vmem:[#allocation2 + $0x228] sm:$0xff] %vm292_vm0, %v759_v36  ;;  %v2556_v37 = vpop.f32.mrb[24].mxu1 }
 0x12b   : > { %v774_v38 = vadd.f32 %v2556_v37, %v3112_v56  ;;  %v768_v39 = vpop.f32.mrb[25].mxu1 }
 0x12c   : > { %v769_v40 = vadd.f32 %v3112_v56, %v768_v39  ;;  %811 = sbr.rel (%p2364_p13) target bundleno = 307 (0x133), region = 52 }
 0x12d   : > { %805 = vst.msk [vmem:[#allocation2 + $0x250] sm:$0xff] %vm292_vm0, %v774_v38 }
 0x12e   : > { %804 = vst.msk [vmem:[#allocation2 + $0x248] sm:$0xff] %vm292_vm0, %v769_v40  ;;  %v2559_v41 = vpop.f32.mrb[26].mxu1 }
 0x12f   : > { %v784_v42 = vadd.f32 %v2559_v41, %v3112_v56  ;;  %v778_v43 = vpop.f32.mrb[27].mxu1 }
 0x130   : > { %v779_v44 = vadd.f32 %v3112_v56, %v778_v43 }
 0x131   : > { %807 = vst.msk [vmem:[#allocation2 + $0x270] sm:$0xff] %vm292_vm0, %v784_v42 }
 0x132   : > { %806 = vst.msk [vmem:[#allocation2 + $0x268] sm:$0xff] %vm292_vm0, %v779_v44 }
 0x133 PF: > { %p2365_p0 = scmp.ne.s32.totalorder %s2817_s27, 1 }
 0x134   : > { %v2837_v46 = vmov (!%p2365_p0), 0.0  }
 0x135   : > { %819 = sbr.rel (%p2365_p0) target bundleno = 316 (0x13c), region = 56  ;;  %821 = vst.msk [vmem:[#allocation2 + $0x128] sm:$0xff] (!%p2365_p0), %vm292_vm0, %v2837_v46  ;;  %822 = vst.msk [vmem:[#allocation2 + $0x130] sm:$0xff] (!%p2365_p0), %vm292_vm0, %v2837_v46 }
 0x136   : > { %823 = vst.msk [vmem:[#allocation2 + $0x268] sm:$0xff] (!%p2365_p0), %vm292_vm0, %v2837_v46  ;;  %824 = vst.msk [vmem:[#allocation2 + $0x270] sm:$0xff] (!%p2365_p0), %vm292_vm0, %v2837_v46 }
 0x13c PF: > { %v1995_v47 = vld [vmem:[%s4364_s5] sm:$0xff]  ;;  %v1996_v48 = vld [vmem:[%s4364_s5 + $0x8] sm:$0xff]  ;;  %v1997_v49 = vld [vmem:[%s4364_s5 + $0x10] sm:$0xff]  ;;  %s2427_s21 = sshll.u32 %s2817_s27, 4  ;;  %s2422_s9 = sshll.u32 %s2821_s28, 5 }
 0x13d   : > { %v2600_v50 = vpack.c.bf16 %v1996_v48, %v1995_v47  ;;  %v1998_v51 = vld [vmem:[%s4364_s5 + $0x18] sm:$0xff]  ;;  %v825_v52 = vld [vmem:[#allocation2 + $0x7] sm:$0xff]  ;;  %v3198_v53 = vld [vmem:[%s4362_s3] ss:$0 sm:$0xff]  ;;  %s2229_s10 = sadd.s32 %s2427_s21, %s2422_s9  ;;  %s2232_s0 = sshll.u32 %s3171_s23, 4  ;;  %s4299_s0 = int_to_ptr.vmem [resolvable:$true] %s2232_s0 }
 0x13e   : > { %v2604_v54 = vpack.c.bf16 %v1998_v51, %v1997_v49  ;;  %v846_v55 = vmul.f32 %v3198_v53, %v825_v52  ;;  %v878_v56 = vld [vmem:[#allocation2 + $0x8] sm:$0xff]  ;;  %v3204_v57 = vld [vmem:[%s4362_s3 + $0x1] ss:$0 sm:$0xff]  ;;  %v3210_v60 = vld [vmem:[%s4362_s3 + $0x2] ss:$0 sm:$0xff]  ;;  %s2423_s13 = sshll.u32 %s2229_s10, 7 }
 0x13f   : > { %v931_v58 = vld [vmem:[#allocation2 + $0x9] sm:$0xff]  ;;  %2601 = vmatprep.subr.bf16.mxu0 %v2600_v50  ;;  %v899_v59 = vmul.f32 %v3204_v57, %v878_v56  ;;  %v3215_v62 = vld [vmem:[%s4362_s3 + $0x4] ss:$0 sm:$0xff]  ;;  %v3221_v1 = vld [vmem:[%s4362_s3 + $0x5] ss:$0 sm:$0xff]  ;;  %s4297_s18 = scalar_lea.hbm %s4366_s7, %s2423_s13  ;;  %s4432_s27 = sand.u32 1, %s2809_s25  }
 0x140   : > { %v985_v61 = vld [vmem:[#allocation2 + $0x27] sm:$0xff]  ;;  %2603 = vmatpush3.bf16.msra.mxu0 %v2600_v50  ;;  %v952_v63 = vmul.f32 %v3210_v60, %v931_v58  ;;  %v3228_v6 = vld [vmem:[%s4362_s3 + $0x6] ss:$0 sm:$0xff]  ;;  %v3273_v31 = vld [vmem:[%s4362_s3 + $0x10] ss:$0 sm:$0xff]  ;;  %s4307_s28 = scalar_lea.sflag [#allocation4], %s4432_s27 }
 0x141   : > { %v1039_v0 = vld [vmem:[#allocation2 + $0x28] sm:$0xff]  ;;  %v848_v3 = vmul.f32 %v3198_v53, %v985_v61  ;;  %2605 = vmatprep.subr.bf16.mxu0 %v2604_v54  ;;  %v915_v4 = vadd.f32 %v899_v59, %v846_v55  ;;  %v1007_v5 = vmul.f32 %v3215_v62, %v985_v61  ;;  %v3278_v32 = vld [vmem:[%s4362_s3 + $0x11] ss:$0 sm:$0xff]  ;;  %v3289_v42 = vld [vmem:[%s4362_s3 + $0x12] ss:$0 sm:$0xff]  ;;  %s2739_s20 = scalar_lea.vmem %s4299_s0, 2048 }
 0x142   : > { %v1092_v2 = vld [vmem:[#allocation2 + $0x29] sm:$0xff]  ;;  %v901_v7 = vmul.f32 %v3204_v57, %v1039_v0  ;;  %v3234_v9 = vld [vmem:[%s4362_s3 + $0x8] ss:$0 sm:$0xff]  ;;  %v1060_v12 = vmul.f32 %v3221_v1, %v1039_v0  ;;  %4399 = vst [vmem:[#allocation6_spill] sm:$0xff] %v3289_v42  ;;  %v3305_v51 = vld [vmem:[%s4362_s3 + $0x14] ss:$0 sm:$0xff]  ;;  %p2740_p1 = scmp.ne.s32.totalorder %s4299_s0, %s2739_s20 }
 0x143   : > { %v1146_v8 = vld [vmem:[#allocation2 + $0x47] sm:$0xff]  ;;  %v954_v10 = vmul.f32 %v3210_v60, %v1092_v2  ;;  %v968_v11 = vadd.f32 %v952_v63, %v915_v4  ;;  %v1113_v18 = vmul.f32 %v3228_v6, %v1092_v2  ;;  %v3310_v52 = vld [vmem:[%s4362_s3 + $0x15] ss:$0 sm:$0xff]  ;;  %s2838_s22 = smov [#allocation3]  }
 0x144   : > { %v1200_v13 = vld [vmem:[#allocation2 + $0x48] sm:$0xff]  ;;  %v917_v17 = vadd.f32 %v901_v7, %v848_v3  ;;  %2607 = vmatpush3.bf16.msra.mxu0 %v2604_v54  ;;  %v1168_v23 = vmul.f32 %v3234_v9, %v1146_v8  ;;  %v1009_v34 = vmul.f32 %v3215_v62, %v1146_v8  ;;  %v3282_v35 = vmul.f32 %v3198_v53, %v1146_v8  ;;  %v3315_v54 = vld [vmem:[%s4362_s3 + $0x16] ss:$0 sm:$0xff]  ;;  %p2741_p2 = pnand %p2740_p1, %p2932_p3  ;;  %s2743_s21 = sshll.u32 %s2838_s22, 4  ;;  %s2744_s21 = int_to_ptr.vmem [resolvable:$false] %s2743_s21 }
 0x145   : > { %v3241_v14 = vld [vmem:[%s4362_s3 + $0x9] ss:$0 sm:$0xff]  ;;  %v3246_v15 = vld [vmem:[%s4362_s3 + $0xa] ss:$0 sm:$0xff]  ;;  %v3252_v19 = vld [vmem:[%s4362_s3 + $0xc] ss:$0 sm:$0xff]  ;;  %v1023_v22 = vadd.f32 %v1007_v5, %v968_v11  ;;  %v1062_v44 = vmul.f32 %v3221_v1, %v1200_v13  ;;  %v3297_v46 = vmul.f32 %v3204_v57, %v1200_v13  ;;  %p2746_p5 = scmp.lt.s32.totalorder %s4299_s0, %s2744_s21 }
 0x146   : > { %v1329_v16 = vld [vmem:[#allocation2 + $0x147] sm:$0xff]  ;;  %v970_v33 = vadd.f32 %v954_v10, %v917_v17  ;;  %v1221_v37 = vmul.f32 %v3241_v14, %v1200_v13  ;;  %4401 = vst [vmem:[#allocation8_spill] sm:$0xff] %v3310_v52  ;;  %4402 = vst [vmem:[#allocation9_spill] sm:$0xff] %v3315_v54  ;;  %v826_v58 = vld [vmem:[#allocation2 + $0xf] sm:$0xff]  ;;  %p2742_p4 = pneg %p2741_p2  ;;  %s2745_s9 = scalar_lea.vmem %s2744_s21, 4096 }
 0x147   : > { %v1383_v20 = vld [vmem:[#allocation2 + $0x148] sm:$0xff]  ;;  %v1351_v24 = vmul.f32 %v3252_v19, %v1329_v16  ;;  %v1076_v36 = vadd.f32 %v1060_v12, %v1023_v22  ;;  %v879_v59 = vld [vmem:[#allocation2 + $0x10] sm:$0xff]  ;;  %v847_v8 = vmul.f32 %v3198_v53, %v826_v58  ;;  %p2747_p6 = scmp.lt.s32.totalorder %s2745_s9, %s2739_s20 }
 0x148   : > { %v3257_v21 = vld [vmem:[%s4362_s3 + $0xd] ss:$0 sm:$0xff]  ;;  %v3265_v27 = vld [vmem:[%s4362_s3 + $0xe] ss:$0 sm:$0xff]  ;;  %v932_v61 = vld [vmem:[#allocation2 + $0x11] sm:$0xff]  ;;  %v1025_v63 = vadd.f32 %v1009_v34, %v970_v33  ;;  %v900_v10 = vmul.f32 %v3204_v57, %v879_v59 }
 0x149   : > { %v1404_v25 = vmul.f32 %v3257_v21, %v1383_v20  ;;  %v1436_v26 = vld [vmem:[#allocation2 + $0x149] sm:$0xff]  ;;  %v1129_v47 = vadd.f32 %v1113_v18, %v1076_v36  ;;  %v953_v17 = vmul.f32 %v3210_v60, %v932_v61  ;;  %p2748_p7 = por %p2747_p6, %p2746_p5 }
 0x14a   : > { %v1490_v28 = vld [vmem:[#allocation2 + $0x167] sm:$0xff]  ;;  %v1457_v30 = vmul.f32 %v3265_v27, %v1436_v26  ;;  %v3327_v11 = vld [vmem:[#allocation2 + $0x2f] sm:$0xff] }
 0x14b   : > { %v3267_v29 = vld [vmem:[#allocation2 + $0x49] sm:$0xff]  ;;  %v1420_v38 = vadd.f32 %v1404_v25, %v1351_v24  ;;  %v1512_v39 = vmul.f32 %v3273_v31, %v1490_v28  ;;  %v1353_v55 = vmul.f32 %v3252_v19, %v1490_v28  ;;  %v1184_v3 = vadd.f32 %v1168_v23, %v1129_v47  ;;  %v1437_v28 = vld [vmem:[#allocation2 + $0x151] sm:$0xff]  ;;  %p2749_p9 = pnand %p2748_p7, %p2742_p4 }
 0x14c   : > { %v1544_v40 = vld [vmem:[#allocation2 + $0x168] sm:$0xff]  ;;  %v1274_v43 = vmul.f32 %v3246_v15, %v3267_v29  ;;  %v1115_v45 = vmul.f32 %v3228_v6, %v3267_v29  ;;  %v3338_v18 = vld [vmem:[#allocation2 + $0x30] sm:$0xff]  ;;  %v916_v23 = vadd.f32 %v900_v10, %v847_v8  ;;  %v1008_v24 = vmul.f32 %v3215_v62, %v3327_v11 }
 0x14d   : > { %v1597_v41 = vld [vmem:[#allocation2 + $0x169] sm:$0xff]  ;;  %v1473_v48 = vadd.f32 %v1457_v30, %v1420_v38  ;;  %v1565_v49 = vmul.f32 %v3278_v32, %v1544_v40  ;;  %v1406_v0 = vmul.f32 %v3257_v21, %v1544_v40  ;;  %v1237_v20 = vadd.f32 %v1221_v37, %v1184_v3  ;;  %v3345_v30 = vld [vmem:[%s4363_s4] ss:$0 sm:$0xff] }
 0x14e   : > { %v3300_v50 = vld [vmem:[#allocation2 + $0x187] sm:$0xff]  ;;  %v1618_v56 = vmul.f32 %v3289_v42, %v1597_v41  ;;  %v1459_v2 = vmul.f32 %v3265_v27, %v1597_v41  ;;  %v1330_v25 = vld [vmem:[#allocation2 + $0x14f] sm:$0xff]  ;;  %v1061_v33 = vmul.f32 %v3221_v1, %v3338_v18  ;;  %v1078_v38 = vadd.f32 %v1062_v44, %v1025_v63 }
 0x14f   : > { %4400 = vst [vmem:[#allocation7_spill] sm:$0xff] %v3300_v50  ;;  %v1528_v4 = vadd.f32 %v1512_v39, %v1473_v48  ;;  %v3321_v5 = vld [vmem:[#allocation2 + $0x188] sm:$0xff]  ;;  %v1673_v12 = vmul.f32 %v3305_v51, %v3300_v50  ;;  %v1384_v26 = vld [vmem:[#allocation2 + $0x150] sm:$0xff]  ;;  %v1352_v34 = vmul.f32 %v3252_v19, %v1330_v25  ;;  %v1290_v39 = vadd.f32 %v1274_v43, %v1237_v20 }
 0x150   : > { %v3323_v7 = vld [vmem:[#allocation2 + $0x189] sm:$0xff]  ;;  %v1726_v13 = vmul.f32 %v3310_v52, %v3321_v5  ;;  %v1405_v36 = vmul.f32 %v3257_v21, %v1384_v26  ;;  %v969_v41 = vadd.f32 %v953_v17, %v916_v23  ;;  %v1458_v47 = vmul.f32 %v3265_v27, %v1437_v28  ;;  %v1093_v48 = vld [vmem:[#allocation2 + $0x31] sm:$0xff] }
 0x151   : > { %v3335_v16 = vmul.f32 %v3315_v54, %v3323_v7  ;;  %v1581_v22 = vadd.f32 %v1565_v49, %v1528_v4  ;;  %v3351_v37 = vld [vmem:[#allocation2 + $0x16f] sm:$0xff]  ;;  %v1422_v61 = vadd.f32 %v1406_v0, %v1353_v55  ;;  %v1514_v3 = vmul.f32 %v3273_v31, %v3300_v50  ;;  %v3372_v20 = vld [vmem:[#allocation2 + $0x67] sm:$0xff] }
 0x152   : > { %v3354_v49 = vld [vmem:[#allocation2 + $0x4f] sm:$0xff]  ;;  %v1421_v58 = vadd.f32 %v1405_v36, %v1352_v34  ;;  %v1513_v59 = vmul.f32 %v3273_v31, %v3351_v37  ;;  %v3361_v4 = vadd.f32 %v3345_v30, %v1290_v39  ;;  %v1024_v44 = vadd.f32 %v1008_v24, %v969_v41 }
 0x153   : > { %v1634_v40 = vadd.f32 %v1618_v56, %v1581_v22  ;;  %v1114_v43 = vmul.f32 %v3228_v6, %v1093_v48  ;;  %v1169_v56 = vmul.f32 %v3234_v9, %v3354_v49  ;;  %v3366_v63 = vld [vmem:[#allocation2 + $0x170] sm:$0xff]  ;;  %v1131_v0 = vadd.f32 %v1115_v45, %v1078_v38  ;;  %v3382_v26 = vld [vmem:[#allocation2 + $0x68] sm:$0xff] }
 0x154   : > { %v3368_v10 = vld [vmem:[#allocation2 + $0x50] sm:$0xff]  ;;  %v1474_v17 = vadd.f32 %v1458_v47, %v1421_v58  ;;  %v1566_v55 = vmul.f32 %v3278_v32, %v3366_v63  ;;  %v1835_v22 = vmul.f32 %v3361_v4, %v3361_v4  ;;  %v1077_v23 = vadd.f32 %v1061_v33, %v1024_v44  ;;  %4403 = vst [vmem:[#allocation10_spill] sm:$0xff] %v3382_v26 }
 0x155   : > { %v1689_v8 = vadd.f32 %v1673_v12, %v1634_v40  ;;  %v1222_v24 = vmul.f32 %v3241_v14, %v3368_v10  ;;  %v3378_v25 = vld [vmem:[#allocation2 + $0x171] sm:$0xff]  ;;  %v1170_v12 = vmul.f32 %v3234_v9, %v3372_v20  ;;  %v1223_v34 = vmul.f32 %v3241_v14, %v3382_v26  ;;  %v3388_v36 = vld [vmem:[#allocation2 + $0x69] sm:$0xff] }
 0x156   : > { %v1529_v28 = vadd.f32 %v1513_v59, %v1474_v17  ;;  %v1619_v45 = vmul.f32 %v3289_v42, %v3378_v25  ;;  %v1475_v33 = vadd.f32 %v1459_v2, %v1422_v61  ;;  %v1851_v38 = vmul.f32 %v1835_v22, %v3361_v4  ;;  %v3393_v58 = vld [vmem:[#allocation2 + $0x51] sm:$0xff] }
 0x157   : > { %v1130_v39 = vadd.f32 %v1114_v43, %v1077_v23  ;;  %v1186_v40 = vadd.f32 %v1170_v12, %v1131_v0  ;;  %v1276_v41 = vmul.f32 %v3246_v15, %v3388_v36  ;;  %v1742_v47 = vadd.f32 %v1726_v13, %v1689_v8  ;;  %v3399_v61 = vld [vmem:[#allocation2 + $0x18f] sm:$0xff] }
 0x158   : > { %v1582_v59 = vadd.f32 %v1566_v55, %v1529_v28  ;;  %v1530_v44 = vadd.f32 %v1514_v3, %v1475_v33  ;;  %v1567_v17 = vmul.f32 %v3278_v32, %v3321_v5  ;;  %v1867_v50 = vmul.f32 0.044715, %v1851_v38  ;;  %v3403_v13 = vld [vmem:[#allocation2 + $0x190] sm:$0xff]  ;;  %v3410_v28 = vld [vmem:[#allocation2 + $0x1a7] sm:$0xff] }
 0x159   : > { %v1185_v26 = vadd.f32 %v1169_v56, %v1130_v39  ;;  %v1275_v2 = vmul.f32 %v3246_v15, %v3393_v58  ;;  %v1239_v43 = vadd.f32 %v1223_v34, %v1186_v40  ;;  %v1674_v22 = vmul.f32 %v3305_v51, %v3399_v61 }
 0x15a   : > { %v1635_v0 = vadd.f32 %v1619_v45, %v1582_v59  ;;  %v1583_v8 = vadd.f32 %v1567_v17, %v1530_v44  ;;  %v1620_v3 = vmul.f32 %v3289_v42, %v3323_v7  ;;  %v1883_v55 = vadd.f32 %v1867_v50, %v3361_v4  ;;  %v3433_v59 = vld [vmem:[#allocation2 + $0x191] sm:$0xff] }
 0x15b   : > { %v1238_v23 = vadd.f32 %v1222_v24, %v1185_v26  ;;  %v1727_v56 = vmul.f32 %v3310_v52, %v3403_v13  ;;  %v1292_v12 = vadd.f32 %v1276_v41, %v1239_v43  ;;  %v1795_v45 = vadd.f32 %v3335_v16, %v1742_v47  ;;  %v3426_v16 = vld [vmem:[%s4363_s4 + $0x1] ss:$0 sm:$0xff] }
 0x15c   : > { %v1675_v34 = vmul.f32 %v3305_v51, %v3410_v28  ;;  %v849_v33 = vmul.f32 %v3198_v53, %v3327_v11  ;;  %v902_v38 = vmul.f32 %v3204_v57, %v3338_v18  ;;  %v1899_v39 = vmul.f32 0.7978846, %v1883_v55 }
 0x15d   : > { %v1291_v50 = vadd.f32 %v1275_v2, %v1238_v23  ;;  %v3420_v24 = vadd.f32 %v3345_v30, %v1292_v12  ;;  %v955_v26 = vmul.f32 %v3210_v60, %v1093_v48  ;;  %v1690_v40 = vadd.f32 %v1674_v22, %v1635_v0  ;;  %v3441_v2 = vld [vmem:[#allocation2 + $0x1a8] sm:$0xff] }
 0x15e   : > { %v1636_v41 = vadd.f32 %v1620_v3, %v1583_v8  ;;  %v918_v47 = vadd.f32 %v902_v38, %v849_v33  ;;  %v1010_v11 = vmul.f32 %v3215_v62, %v3354_v49  ;;  %2687 = vtanh.f32 %v1899_v39  ;;  %4406 = vst [vmem:[#allocation13_spill] sm:$0xff] %v3441_v2 }
 0x15f   : > { %4404 = vst [vmem:[#allocation11_spill] sm:$0xff] %v3420_v24  ;;  %v3431_v18 = vadd.f32 %v3345_v30, %v1291_v50  ;;  %v1837_v48 = vmul.f32 %v3420_v24, %v3420_v24  ;;  %v956_v44 = vmul.f32 %v3210_v60, %v3267_v29  ;;  %v1780_v17 = vmul.f32 %v3315_v54, %v3433_v59 }
 0x160   : > { %v971_v43 = vadd.f32 %v955_v26, %v918_v47  ;;  %v1063_v0 = vmul.f32 %v3221_v1, %v3368_v10  ;;  %v919_v22 = vadd.f32 %v3297_v46, %v3282_v35  ;;  %v3448_v8 = vadd.f32 %v3426_v16, %v1795_v45  ;;  %v3458_v35 = vld [vmem:[#allocation2 + $0x1a9] sm:$0xff] }
 0x161   : > { %4405 = vst [vmem:[#allocation12_spill] sm:$0xff] %v3431_v18  ;;  %v1836_v3 = vmul.f32 %v3431_v18, %v3431_v18  ;;  %v1728_v29 = vmul.f32 %v3310_v52, %v3441_v2  ;;  %v1853_v55 = vmul.f32 %v1837_v48, %v3420_v24  ;;  %v1743_v23 = vadd.f32 %v1727_v56, %v1690_v40  ;;  %v3460_v45 = vld [vmem:[#allocation2 + $0x6f] sm:$0xff] }
 0x162   : > { %v1691_v12 = vadd.f32 %v1675_v34, %v1636_v41  ;;  %v1026_v33 = vadd.f32 %v1010_v11, %v971_v43  ;;  %v1116_v38 = vmul.f32 %v3228_v6, %v3393_v58  ;;  %4407 = vst [vmem:[#allocation14_spill] sm:$0xff] %v3458_v35  ;;  %4408 = vst [vmem:[#allocation15_spill] sm:$0xff] %v3460_v45  ;;  %v3473_v48 = vld [vmem:[#allocation2 + $0x70] sm:$0xff] }
 0x163   : > { %v1852_v39 = vmul.f32 %v1836_v3, %v3431_v18  ;;  %v1869_v46 = vmul.f32 0.044715, %v1853_v55  ;;  %v1354_v50 = vmul.f32 %v3252_v19, %v3351_v37  ;;  %v1407_v26 = vmul.f32 %v3257_v21, %v3366_v63 }
 0x164   : > { %v1781_v56 = vmul.f32 %v3315_v54, %v3458_v35  ;;  %v1079_v34 = vadd.f32 %v1063_v0, %v1026_v33  ;;  %v1171_v40 = vmul.f32 %v3234_v9, %v3460_v45  ;;  %v1460_v41 = vmul.f32 %v3265_v27, %v3378_v25  ;;  %v3479_v33 = vld [vmem:[#allocation2 + $0x71] sm:$0xff] }
 0x165   : > { %v1868_v47 = vmul.f32 0.044715, %v1852_v39  ;;  %v1885_v11 = vadd.f32 %v1869_v46, %v3420_v24  ;;  %v1423_v43 = vadd.f32 %v1407_v26, %v1354_v50  ;;  %v1515_v37 = vmul.f32 %v3273_v31, %v3399_v61 }
 0x166   : > { %v1796_v63 = vadd.f32 %v1780_v17, %v1743_v23  ;;  %v1744_v3 = vadd.f32 %v1728_v29, %v1691_v12  ;;  %v1132_v55 = vadd.f32 %v1116_v38, %v1079_v34  ;;  %v1224_v0 = vmul.f32 %v3241_v14, %v3473_v48  ;;  %v4409_v17 = vld [vmem:[#allocation10_spill] sm:$0xff] }
 0x167   : > { %v1884_v45 = vadd.f32 %v1868_v47, %v3431_v18  ;;  %v1901_v25 = vmul.f32 0.7978846, %v1885_v11  ;;  %v1277_v39 = vmul.f32 %v3246_v15, %v3479_v33  ;;  %v1476_v46 = vadd.f32 %v1460_v41, %v1423_v43 }
 0x168   : > { %v1187_v24 = vadd.f32 %v1171_v40, %v1132_v55  ;;  %v972_v50 = vadd.f32 %v956_v44, %v919_v22  ;;  %v1011_v26 = vmul.f32 %v3215_v62, %v3372_v20  ;;  %v1064_v29 = vmul.f32 %v3221_v1, %v4409_v17  ;;  %v2688_v23 = vpop.eup %2687  ;;  %v3492_v44 = vld [vmem:[#allocation2 + $0x87] sm:$0xff] }
 0x169   : > { %v1900_v12 = vmul.f32 0.7978846, %v1884_v45  ;;  %2689 = vtanh.f32 %v1901_v25  ;;  %v1531_v38 = vadd.f32 %v1515_v37, %v1476_v46  ;;  %v1568_v34 = vmul.f32 %v3278_v32, %v3403_v13  ;;  %v4410_v25 = vld [vmem:[#allocation7_spill] sm:$0xff] }
 0x16a   : > { %v1931_v47 = vadd.f32 1.0, %v2688_v23  ;;  %v1240_v11 = vadd.f32 %v1224_v0, %v1187_v24  ;;  %v1027_v18 = vadd.f32 %v1011_v26, %v972_v50  ;;  %v1117_v40 = vmul.f32 %v3228_v6, %v3388_v36  ;;  %v3503_v50 = vld [vmem:[#allocation2 + $0x88] sm:$0xff] }
 0x16b   : > { %v3495_v22 = vadd.f32 %v3426_v16, %v1796_v63  ;;  %2691 = vtanh.f32 %v1900_v12  ;;  %v1797_v41 = vadd.f32 %v1781_v56, %v1744_v3  ;;  %v1172_v45 = vmul.f32 %v3234_v9, %v3492_v44 }
 0x16c   : > { %v1947_v43 = vmul.f32 0.5, %v1931_v47  ;;  %v1293_v37 = vadd.f32 %v1277_v39, %v1240_v11  ;;  %v1080_v55 = vadd.f32 %v1064_v29, %v1027_v18  ;;  %v1355_v24 = vmul.f32 %v3252_v19, %v4410_v25  ;;  %v3513_v18 = vld [vmem:[#allocation2 + $0x1af] sm:$0xff] }
 0x16d   : > { %v1584_v0 = vadd.f32 %v1568_v34, %v1531_v38  ;;  %v1621_v46 = vmul.f32 %v3289_v42, %v3433_v59  ;;  %v1408_v63 = vmul.f32 %v3257_v21, %v3321_v5  ;;  %v1461_v56 = vmul.f32 %v3265_v27, %v3323_v7  ;;  %v3520_v5 = vld [vmem:[#allocation2 + $0x89] sm:$0xff]  ;;  %v3538_v25 = vld [vmem:[#allocation2 + $0x1b1] sm:$0xff] }
 0x16e   : > { %v1963_v3 = vmul.f32 %v1947_v43, %v3361_v4  ;;  %v3511_v39 = vadd.f32 %v3345_v30, %v1293_v37  ;;  %v1133_v26 = vadd.f32 %v1117_v40, %v1080_v55  ;;  %v1225_v29 = vmul.f32 %v3241_v14, %v3503_v50  ;;  %4411 = vst [vmem:[#allocation10_spill] sm:$0xff] %v3520_v5 }
 0x16f   : > { %v1821_v23 = vadd.f32 %v3426_v16, %v1797_v41  ;;  %v1676_v12 = vmul.f32 %v3305_v51, %v3513_v18  ;;  %v1424_v38 = vadd.f32 %v1408_v63, %v1355_v24  ;;  %v1516_v7 = vmul.f32 %v3273_v31, %v3410_v28  ;;  %v3529_v41 = vld [vmem:[#allocation2 + $0x1b0] sm:$0xff]  ;;  %4412 = vst [vmem:[#allocation7_spill] sm:$0xff] %v3538_v25 }
 0x170   : > { %v1979_v4 = vmul.f32 %v1963_v3, %v3448_v8  ;;  %v1838_v34 = vmul.f32 %v3511_v39, %v3511_v39  ;;  %v1188_v47 = vadd.f32 %v1172_v45, %v1133_v26  ;;  %v1278_v11 = vmul.f32 %v3246_v15, %v3520_v5  ;;  %v3549_v5 = vld [vmem:[#allocation2 + $0x1c7] sm:$0xff] }
 0x171   : > { %v1637_v40 = vadd.f32 %v1621_v46, %v1584_v0  ;;  %v1477_v43 = vadd.f32 %v1461_v56, %v1424_v38  ;;  %v1569_v37 = vmul.f32 %v3278_v32, %v3441_v2  ;;  %v851_v55 = vmul.f32 %v3198_v53, %v3354_v49 }
 0x172   : > { %2568 = vmatprep.mubr.msk.f32.mxu0 %vm292_vm0, %v1979_v4  ;;  %v1729_v8 = vmul.f32 %v3310_v52, %v3529_v41  ;;  %v1854_v45 = vmul.f32 %v1838_v34, %v3511_v39  ;;  %v1241_v24 = vadd.f32 %v1225_v29, %v1188_v47  ;;  %v904_v0 = vmul.f32 %v3204_v57, %v3368_v10 }
 0x173   : > { %v2690_v46 = vpop.eup %2689  ;;  %v1782_v63 = vmul.f32 %v3315_v54, %v3538_v25  ;;  %v1532_v56 = vadd.f32 %v1516_v7, %v1477_v43  ;;  %v1622_v49 = vmul.f32 %v3289_v42, %v3458_v35  ;;  %v957_v3 = vmul.f32 %v3210_v60, %v3393_v58  ;;  %v4413_v25 = vld [vmem:[#allocation15_spill] sm:$0xff] }
 0x174   : > { %v1933_v26 = vadd.f32 1.0, %v2690_v46  ;;  %v1870_v38 = vmul.f32 0.044715, %v1854_v45  ;;  %v1294_v4 = vadd.f32 %v1278_v11, %v1241_v24  ;;  %v920_v29 = vadd.f32 %v904_v0, %v851_v55  ;;  %v3559_v11 = vld [vmem:[#allocation2 + $0x1c8] sm:$0xff] }
 0x175   : > { %v2692_v34 = vpop.eup %2691  ;;  %v1692_v47 = vadd.f32 %v1676_v12, %v1637_v40  ;;  %v1585_v10 = vadd.f32 %v1569_v37, %v1532_v56  ;;  %v1677_v2 = vmul.f32 %v3305_v51, %v3549_v5  ;;  %v1012_v7 = vmul.f32 %v3215_v62, %v4413_v25  ;;  %4414 = vst [vmem:[#allocation15_spill] sm:$0xff] %v3559_v11  ;;  %v4415_v24 = vld [vmem:[#allocation11_spill] sm:$0xff] }
 0x176   : > { %v1932_v43 = vadd.f32 1.0, %v2692_v34  ;;  %v1949_v35 = vmul.f32 0.5, %v1933_v26  ;;  %v1886_v42 = vadd.f32 %v1870_v38, %v3511_v39  ;;  %v3557_v58 = vadd.f32 %v3345_v30, %v1294_v4  ;;  %v4416_v4 = vld [vmem:[#allocation12_spill] sm:$0xff] }
 0x177   : > { %v1638_v45 = vadd.f32 %v1622_v49, %v1585_v10  ;;  %v1730_v12 = vmul.f32 %v3310_v52, %v3559_v11  ;;  %v973_v40 = vadd.f32 %v957_v3, %v920_v29  ;;  %v1065_v37 = vmul.f32 %v3221_v1, %v3473_v48  ;;  %v3581_v11 = vld [vmem:[#allocation2 + $0x90] sm:$0xff] }
 0x178   : > { %v1948_v55 = vmul.f32 0.5, %v1932_v43  ;;  %v1965_v0 = vmul.f32 %v1949_v35, %v4415_v24  ;;  %v1902_v46 = vmul.f32 0.7978846, %v1886_v42  ;;  %v1839_v56 = vmul.f32 %v3557_v58, %v3557_v58  ;;  %v3576_v42 = vld [vmem:[#allocation2 + $0x8f] sm:$0xff] }
 0x179   : > { %v1028_v26 = vadd.f32 %v1012_v7, %v973_v40  ;;  %v1118_v38 = vmul.f32 %v3228_v6, %v3479_v33  ;;  %v1356_v49 = vmul.f32 %v3252_v19, %v3399_v61  ;;  %v1409_v3 = vmul.f32 %v3257_v21, %v3403_v13 }
 0x17a   : > { %v1964_v29 = vmul.f32 %v1948_v55, %v4416_v4  ;;  %v1745_v34 = vadd.f32 %v1729_v8, %v1692_v47  ;;  %2693 = vtanh.f32 %v1902_v46  ;;  %v1855_v35 = vmul.f32 %v1839_v56, %v3557_v58  ;;  %v3585_v47 = vld [vmem:[#allocation2 + $0x1c9] sm:$0xff] }
 0x17b   : > { %v1981_v10 = vmul.f32 %v1965_v0, %v1821_v23  ;;  %v1693_v43 = vadd.f32 %v1677_v2, %v1638_v45  ;;  %v1081_v7 = vadd.f32 %v1065_v37, %v1028_v26  ;;  %v1173_v40 = vmul.f32 %v3234_v9, %v3576_v42  ;;  %v3589_v2 = vld [vmem:[#allocation2 + $0x91] sm:$0xff] }
 0x17c   : > { %v1980_v24 = vmul.f32 %v1964_v29, %v3495_v22  ;;  %v1871_v61 = vmul.f32 0.044715, %v1855_v35  ;;  %v1425_v13 = vadd.f32 %v1409_v3, %v1356_v49  ;;  %v1462_v8 = vmul.f32 %v3265_v27, %v3433_v59 }
 0x17d   : > { %v1134_v55 = vadd.f32 %v1118_v38, %v1081_v7  ;;  %v1226_v23 = vmul.f32 %v3241_v14, %v3581_v11  ;;  %v1798_v45 = vadd.f32 %v1782_v63, %v1745_v34  ;;  %v1783_v22 = vmul.f32 %v3315_v54, %v3585_v47 }
 0x17e   : > { %2569 = vmatmul.mubr.msk.f32.vlgmr.msra.gmra.mrb[12].mxu0 %vm292_vm0, %v1980_v24  ;;  %v1887_v37 = vadd.f32 %v1871_v61, %v3557_v58  ;;  %v1279_v0 = vmul.f32 %v3246_v15, %v3589_v2  ;;  %v1746_v59 = vadd.f32 %v1730_v12, %v1693_v43  ;;  %v1517_v56 = vmul.f32 %v3273_v31, %v3513_v18  ;;  %v4417_v61 = vld [vmem:[#allocation13_spill] sm:$0xff] }
 0x17f   : > { %2571 = vmatprep.mubr.msk.f32.mxu0 %vm292_vm0, %v1981_v10  ;;  %v1189_v46 = vadd.f32 %v1173_v40, %v1134_v55  ;;  %v852_v26 = vmul.f32 %v3198_v53, %v3372_v20  ;;  %v1478_v63 = vadd.f32 %v1462_v8, %v1425_v13  ;;  %v905_v49 = vmul.f32 %v3204_v57, %v4409_v17  ;;  %v3613_v40 = vld [vmem:[#allocation2 + $0x1cf] sm:$0xff] }
 0x180   : > { %v1903_v38 = vmul.f32 0.7978846, %v1887_v37  ;;  %v958_v3 = vmul.f32 %v3210_v60, %v3388_v36  ;;  %v1822_v29 = vadd.f32 %v3426_v16, %v1798_v45  ;;  %v1013_v34 = vmul.f32 %v3215_v62, %v3492_v44  ;;  %v4419_v45 = vld [vmem:[#allocation6_spill] sm:$0xff]  ;;  %v3626_v37 = vld [vmem:[#allocation2 + $0x1d0] sm:$0xff] }
 0x181   : > { %v1242_v4 = vadd.f32 %v1226_v23, %v1189_v46  ;;  %v921_v12 = vadd.f32 %v905_v49, %v852_v26  ;;  %v1799_v35 = vadd.f32 %v1783_v22, %v1746_v59  ;;  %v1570_v20 = vmul.f32 %v3278_v32, %v3529_v41  ;;  %v4418_v23 = vld [vmem:[#allocation7_spill] sm:$0xff]  ;;  %v4421_v46 = vld [vmem:[#allocation10_spill] sm:$0xff] }
 0x182   : > { %2695 = vtanh.f32 %v1903_v38  ;;  %v1357_v43 = vmul.f32 %v3252_v19, %v3410_v28  ;;  %v1533_v7 = vadd.f32 %v1517_v56, %v1478_v63  ;;  %v1066_v24 = vmul.f32 %v3221_v1, %v3503_v50  ;;  %v4422_v38 = vld [vmem:[#allocation14_spill] sm:$0xff] }
 0x183   : > { %v1295_v10 = vadd.f32 %v1279_v0, %v1242_v4  ;;  %v974_v36 = vadd.f32 %v958_v3, %v921_v12  ;;  %v1410_v13 = vmul.f32 %v3257_v21, %v4417_v61  ;;  %v1623_v22 = vmul.f32 %v4419_v45, %v4418_v23  ;;  %v3628_v0 = vld [vmem:[#allocation2 + $0x1d1] sm:$0xff] }
 0x184   : > { %v2694_v17 = vpop.eup %2693  ;;  %v1678_v28 = vmul.f32 %v3305_v51, %v3613_v40  ;;  %4420 = vst [vmem:[#allocation11_spill] sm:$0xff] %v3628_v0  ;;  %v1119_v56 = vmul.f32 %v3228_v6, %v4421_v46  ;;  %v1463_v63 = vmul.f32 %v3265_v27, %v4422_v38  ;;  %v1731_v3 = vmul.f32 %v3310_v52, %v3626_v37  ;;  %v3660_v52 = vld [vmem:[#allocation2 + $0xa9] sm:$0xff] }
 0x185   : > { %v1934_v8 = vadd.f32 1.0, %v2694_v17  ;;  %v3620_v55 = vadd.f32 %v3345_v30, %v1295_v10  ;;  %v1029_v59 = vadd.f32 %v1013_v34, %v974_v36  ;;  %v1426_v26 = vadd.f32 %v1410_v13, %v1357_v43  ;;  %v3642_v10 = vld [vmem:[#allocation2 + $0xa7] sm:$0xff] }
 0x186   : > { %v3638_v4 = vmul.f32 %v3315_v54, %v3628_v0  ;;  %v1586_v34 = vadd.f32 %v1570_v20, %v1533_v7  ;;  %v1174_v43 = vmul.f32 %v3234_v9, %v3642_v10  ;;  %v3646_v36 = vld [vmem:[#allocation2 + $0xa8] sm:$0xff]  ;;  %v853_v61 = vmul.f32 %v3198_v53, %v4413_v25 }
 0x187   : > { %v1950_v49 = vmul.f32 0.5, %v1934_v8  ;;  %v1840_v12 = vmul.f32 %v3620_v55, %v3620_v55  ;;  %v1082_v17 = vadd.f32 %v1066_v24, %v1029_v59  ;;  %4423 = vst [vmem:[#allocation12_spill] sm:$0xff] %v3646_v36  ;;  %v1227_v38 = vmul.f32 %v3241_v14, %v3646_v36 }
 0x188   : > { %v906_v0 = vmul.f32 %v3204_v57, %v3473_v48  ;;  %v1479_v7 = vadd.f32 %v1463_v63, %v1426_v26  ;;  %v1518_v24 = vmul.f32 %v3273_v31, %v3549_v5  ;;  %v959_v59 = vmul.f32 %v3210_v60, %v3479_v33 }
 0x189   : > { %v1966_v13 = vmul.f32 %v1950_v49, %v3511_v39  ;;  %v1856_v8 = vmul.f32 %v1840_v12, %v3620_v55  ;;  %v1135_v20 = vadd.f32 %v1119_v56, %v1082_v17  ;;  %v1014_v49 = vmul.f32 %v3215_v62, %v3576_v42 }
 0x18a   : > { %v922_v39 = vadd.f32 %v906_v0, %v853_v61  ;;  %v1823_v36 = vadd.f32 %v3426_v16, %v1799_v35  ;;  %v1639_v48 = vadd.f32 %v1623_v22, %v1586_v34  ;;  %v1280_v26 = vmul.f32 %v3246_v15, %v3660_v52 }
 0x18b   : > { %v1982_v54 = vmul.f32 %v1966_v13, %v1822_v29  ;;  %v1872_v25 = vmul.f32 0.044715, %v1856_v8  ;;  %v1190_v56 = vadd.f32 %v1174_v43, %v1135_v20  ;;  %v1067_v0 = vmul.f32 %v3221_v1, %v3581_v11  ;;  %v4424_v13 = vld [vmem:[#allocation15_spill] sm:$0xff] }
 0x18c   : > { %v2696_v12 = vpop.eup %2695  ;;  %v975_v29 = vadd.f32 %v959_v59, %v922_v39  ;;  %v1534_v61 = vadd.f32 %v1518_v24, %v1479_v7  ;;  %v1571_v8 = vmul.f32 %v3278_v32, %v4424_v13  ;;  %v1120_v35 = vmul.f32 %v3228_v6, %v3589_v2  ;;  %v3677_v59 = vld [vmem:[#allocation2 + $0xaf] sm:$0xff] }
 0x18d   : > { %2572 = vmatmul.mubr.msk.f32.gmra.mrb[14].mxu0 %vm292_vm0, %v1982_v54  ;;  %v1935_v63 = vadd.f32 1.0, %v2696_v12  ;;  %v1888_v33 = vadd.f32 %v1872_v25, %v3620_v55  ;;  %v1243_v17 = vadd.f32 %v1227_v38, %v1190_v56  ;;  %v1358_v54 = vmul.f32 %v3252_v19, %v3513_v18 }
 0x18e   : > { %v1030_v43 = vadd.f32 %v1014_v49, %v975_v29  ;;  %v1694_v20 = vadd.f32 %v1678_v28, %v1639_v48  ;;  %v1411_v38 = vmul.f32 %v3257_v21, %v3529_v41  ;;  %v1464_v7 = vmul.f32 %v3265_v27, %v4418_v23  ;;  %v3691_v28 = vld [vmem:[#allocation2 + $0xb0] sm:$0xff] }
 0x18f   : > { %v1951_v22 = vmul.f32 0.5, %v1935_v63  ;;  %v1904_v34 = vmul.f32 0.7978846, %v1888_v33  ;;  %v1296_v25 = vadd.f32 %v1280_v26, %v1243_v17  ;;  %v1175_v49 = vmul.f32 %v3234_v9, %v3677_v59  ;;  %v3703_v17 = vld [vmem:[#allocation2 + $0xb1] sm:$0xff] }
 0x190   : > { %v1083_v39 = vadd.f32 %v1067_v0, %v1030_v43  ;;  %v1624_v18 = vmul.f32 %v4419_v45, %v3585_v47  ;;  %v1427_v48 = vadd.f32 %v1411_v38, %v1358_v54  ;;  %v1519_v41 = vmul.f32 %v3273_v31, %v3613_v40  ;;  %v3719_v38 = vld [vmem:[#allocation2 + $0x1e9] sm:$0xff] }
 0x191   : > { %v1967_v24 = vmul.f32 %v1951_v22, %v3557_v58  ;;  %2697 = vtanh.f32 %v1904_v34  ;;  %v3687_v12 = vadd.f32 %v3345_v30, %v1296_v25  ;;  %v1587_v56 = vadd.f32 %v1571_v8, %v1534_v61  ;;  %v3695_v58 = vld [vmem:[#allocation2 + $0x1e7] sm:$0xff] }
 0x192   : > { %v1136_v26 = vadd.f32 %v1120_v35, %v1083_v39  ;;  %v1228_v63 = vmul.f32 %v3241_v14, %v3691_v28  ;;  %v1747_v33 = vadd.f32 %v1731_v3, %v1694_v20  ;;  %v1679_v29 = vmul.f32 %v3305_v51, %v3695_v58  ;;  %v3717_v25 = vld [vmem:[#allocation2 + $0x1e8] sm:$0xff]  ;;  %v4425_v39 = vld [vmem:[#allocation8_spill] sm:$0xff] }
 0x193   : > { %v1983_v23 = vmul.f32 %v1967_v24, %v1823_v36  ;;  %v1841_v0 = vmul.f32 %v3687_v12, %v3687_v12  ;;  %v1480_v22 = vadd.f32 %v1464_v7, %v1427_v48  ;;  %v1281_v61 = vmul.f32 %v3246_v15, %v3703_v17  ;;  %v4426_v48 = vld [vmem:[#allocation9_spill] sm:$0xff] }
 0x194   : > { %v1191_v36 = vadd.f32 %v1175_v49, %v1136_v26  ;;  %v854_v8 = vmul.f32 %v3198_v53, %v3492_v44  ;;  %v907_v3 = vmul.f32 %v3204_v57, %v3503_v50  ;;  %v1572_v43 = vmul.f32 %v3278_v32, %v3626_v37 }
 0x195   : > { %2574 = vmatprep.mubr.msk.f32.mxu0 %vm292_vm0, %v1983_v23  ;;  %v1857_v35 = vmul.f32 %v1841_v0, %v3687_v12  ;;  %v1535_v34 = vadd.f32 %v1519_v41, %v1480_v22  ;;  %v960_v54 = vmul.f32 %v3210_v60, %v4421_v46  ;;  %v1640_v20 = vadd.f32 %v1624_v18, %v1587_v56  ;;  %v4427_v18 = vld [vmem:[#allocation11_spill] sm:$0xff]  ;;  %v4428_v0 = vld [vmem:[#allocation12_spill] sm:$0xff] }
 0x196   : > { %v1244_v7 = vadd.f32 %v1228_v63, %v1191_v36  ;;  %v923_v24 = vadd.f32 %v907_v3, %v854_v8  ;;  %v1015_v44 = vmul.f32 %v3215_v62, %v3642_v10  ;;  %v1800_v50 = vadd.f32 %v3638_v4, %v1747_v33 }
 0x197   : > { %v1732_v49 = vmul.f32 %v4425_v39, %v3717_v25  ;;  %v1785_v41 = vmul.f32 %v4426_v48, %v3719_v38  ;;  %v1873_v23 = vmul.f32 0.044715, %v1857_v35  ;;  %v1625_v56 = vmul.f32 %v4419_v45, %v4427_v18 }
 0x198   : > { %v1297_v46 = vadd.f32 %v1281_v61, %v1244_v7  ;;  %v976_v26 = vadd.f32 %v960_v54, %v923_v24  ;;  %v1068_v63 = vmul.f32 %v3221_v1, %v4428_v0  ;;  %v1588_v36 = vadd.f32 %v1572_v43, %v1535_v34  ;;  %v3742_v0 = vld [vmem:[#allocation2 + $0xc7] sm:$0xff] }
 0x199   : > { %v1889_v22 = vadd.f32 %v1873_v23, %v3687_v12  ;;  %v1359_v4 = vmul.f32 %v3252_v19, %v3549_v5  ;;  %v1412_v33 = vmul.f32 %v3257_v21, %v4424_v13  ;;  %v1695_v3 = vadd.f32 %v1679_v29, %v1640_v20  ;;  %v3747_v13 = vld [vmem:[#allocation2 + $0x1ef] sm:$0xff] }
 0x19a   : > { %v3738_v61 = vadd.f32 %v3345_v30, %v1297_v46  ;;  %v1031_v35 = vadd.f32 %v1015_v44, %v976_v26  ;;  %v1121_v54 = vmul.f32 %v3228_v6, %v3660_v52  ;;  %v1465_v5 = vmul.f32 %v3265_v27, %v3585_v47 }
 0x19b   : > { %v2698_v8 = vpop.eup %2697  ;;  %v1905_v24 = vmul.f32 0.7978846, %v1889_v22  ;;  %v1428_v34 = vadd.f32 %v1412_v33, %v1359_v4  ;;  %v1824_v43 = vadd.f32 %v3426_v16, %v1800_v50  ;;  %v1176_v44 = vmul.f32 %v3234_v9, %v3742_v0  ;;  %v3755_v22 = vld [vmem:[#allocation2 + $0xc8] sm:$0xff] }
 0x19c   : > { %v1936_v7 = vadd.f32 1.0, %v2698_v8  ;;  %v1842_v29 = vmul.f32 %v3738_v61, %v3738_v61  ;;  %v1084_v20 = vadd.f32 %v1068_v63, %v1031_v35  ;;  %v1641_v46 = vadd.f32 %v1625_v56, %v1588_v36  ;;  %v3760_v8 = vld [vmem:[#allocation2 + $0xc9] sm:$0xff] }
 0x19d   : > { %2699 = vtanh.f32 %v1905_v24  ;;  %v1680_v26 = vmul.f32 %v3305_v51, %v3747_v13  ;;  %v1748_v47 = vadd.f32 %v1732_v49, %v1695_v3  ;;  %v1229_v33 = vmul.f32 %v3241_v14, %v3755_v22 }
 0x19e   : > { %v1952_v23 = vmul.f32 0.5, %v1936_v7  ;;  %v1858_v50 = vmul.f32 %v1842_v29, %v3738_v61  ;;  %v1137_v4 = vadd.f32 %v1121_v54, %v1084_v20  ;;  %v1282_v35 = vmul.f32 %v3246_v15, %v3760_v8  ;;  %v3767_v7 = vld [vmem:[#allocation2 + $0x1f0] sm:$0xff] }
 0x19f   : > { %v1481_v56 = vadd.f32 %v1465_v5, %v1428_v34  ;;  %v1520_v36 = vmul.f32 %v3273_v31, %v3695_v58  ;;  %v855_v54 = vmul.f32 %v3198_v53, %v3576_v42  ;;  %v908_v24 = vmul.f32 %v3204_v57, %v3581_v11  ;;  %v3777_v5 = vld [vmem:[#allocation2 + $0x1f1] sm:$0xff] }
 0x1a0   : > { %v1968_v63 = vmul.f32 %v1952_v23, %v3620_v55  ;;  %v1874_v49 = vmul.f32 0.044715, %v1858_v50  ;;  %v1192_v3 = vadd.f32 %v1176_v44, %v1137_v4  ;;  %v1696_v20 = vadd.f32 %v1680_v26, %v1641_v46 }
 0x1a1   : > { %v1733_v55 = vmul.f32 %v4425_v39, %v3767_v7  ;;  %v961_v34 = vmul.f32 %v3210_v60, %v3589_v2  ;;  %v924_v44 = vadd.f32 %v908_v24, %v855_v54  ;;  %v1016_v53 = vmul.f32 %v3215_v62, %v3677_v59 }
 0x1a2   : > { %v1984_v29 = vmul.f32 %v1968_v63, %v1824_v43  ;;  %v1890_v23 = vadd.f32 %v1874_v49, %v3738_v61  ;;  %v1245_v50 = vadd.f32 %v1229_v33, %v1192_v3  ;;  %v1801_v57 = vadd.f32 %v1785_v41, %v1748_v47  ;;  %v3803_v49 = vld [vmem:[#allocation2 + $0xcf] sm:$0xff] }
 0x1a3   : > { %v1786_v11 = vmul.f32 %v4426_v48, %v3777_v5  ;;  %v1536_v42 = vadd.f32 %v1520_v36, %v1481_v56  ;;  %v1573_v43 = vmul.f32 %v3278_v32, %v3717_v25  ;;  %v977_v46 = vadd.f32 %v961_v34, %v924_v44 }
 0x1a4   : > { %2575 = vmatmul.mubr.msk.f32.gmra.mrb[16].mxu0 %vm292_vm0, %v1984_v29  ;;  %v1906_v60 = vmul.f32 0.7978846, %v1890_v23  ;;  %v1298_v2 = vadd.f32 %v1282_v35, %v1245_v50  ;;  %v1069_v26 = vmul.f32 %v3221_v1, %v3691_v28  ;;  %v1749_v4 = vadd.f32 %v1733_v55, %v1696_v20  ;;  %v3820_v50 = vld [vmem:[#allocation2 + $0xd1] sm:$0xff] }
 0x1a5   : > { %v1122_v62 = vmul.f32 %v3228_v6, %v3703_v17  ;;  %v1360_v41 = vmul.f32 %v3252_v19, %v3613_v40  ;;  %v1413_v47 = vmul.f32 %v3257_v21, %v3626_v37  ;;  %v1032_v63 = vadd.f32 %v1016_v53, %v977_v46  ;;  %v3805_v21 = vld [vmem:[#allocation2 + $0x207] sm:$0xff] }
 0x1a6   : > { %2701 = vtanh.f32 %v1906_v60  ;;  %v3796_v33 = vadd.f32 %v3345_v30, %v1298_v2  ;;  %v1466_v35 = vmul.f32 %v3265_v27, %v4427_v18  ;;  %v1825_v1 = vadd.f32 %v3426_v16, %v1801_v57  ;;  %v3811_v18 = vld [vmem:[#allocation2 + $0xd0] sm:$0xff]  ;;  %v3844_v2 = vld [vmem:[%s4362_s3 + $0x2] ss:$0 sm:$0xff] }
 0x1a7   : > { %v2700_v56 = vpop.eup %2699  ;;  %v1589_v36 = vadd.f32 %v1573_v43, %v1536_v42  ;;  %v1626_v6 = vmul.f32 %v4419_v45, %v3719_v38  ;;  %v1429_v19 = vadd.f32 %v1413_v47, %v1360_v41  ;;  %v1085_v3 = vadd.f32 %v1069_v26, %v1032_v63  ;;  %v4429_v57 = vld [vmem:[#allocation12_spill] sm:$0xff]  ;;  %v3839_v43 = vld [vmem:[#allocation2 + $0x208] sm:$0xff] }
 0x1a8   : > { %v1937_v40 = vadd.f32 1.0, %v2700_v56  ;;  %v1843_v37 = vmul.f32 %v3796_v33, %v3796_v33  ;;  %v1177_v27 = vmul.f32 %v3234_v9, %v3803_v49  ;;  %v1802_v54 = vadd.f32 %v1786_v11, %v1749_v4 }
 0x1a9   : > { %v1681_v24 = vmul.f32 %v3305_v51, %v3805_v21  ;;  %v1230_v29 = vmul.f32 %v3241_v14, %v3811_v18  ;;  %v1521_v20 = vmul.f32 %v3273_v31, %v3747_v13  ;;  %v1138_v23 = vadd.f32 %v1122_v62, %v1085_v3  ;;  %v3827_v51 = vld [vmem:[%s4362_s3] ss:$0 sm:$0xff]  ;;  %v3834_v31 = vld [vmem:[%s4362_s3 + $0x1] ss:$0 sm:$0xff] }
 0x1aa   : > { %v1953_v55 = vmul.f32 0.5, %v1937_v40  ;;  %v1859_v34 = vmul.f32 %v1843_v37, %v3796_v33  ;;  %v1482_v44 = vadd.f32 %v1466_v35, %v1429_v19  ;;  %v1642_v9 = vadd.f32 %v1626_v6, %v1589_v36  ;;  %v3874_v37 = vld [vmem:[%s4362_s3 + $0xc] ss:$0 sm:$0xff] }
 0x1ab   : > { %v1283_v53 = vmul.f32 %v3246_v15, %v3820_v50  ;;  %v856_v14 = vmul.f32 %v3827_v51, %v3642_v10  ;;  %v909_v11 = vmul.f32 %v3834_v31, %v4429_v57  ;;  %v1193_v60 = vadd.f32 %v1177_v27, %v1138_v23  ;;  %v3900_v23 = vld [vmem:[%s4362_s3 + $0xe] ss:$0 sm:$0xff] }
 0x1ac   : > { %v1969_v42 = vmul.f32 %v1953_v55, %v3687_v12  ;;  %v1875_v15 = vmul.f32 0.044715, %v1859_v34  ;;  %v962_v10 = vmul.f32 %v3844_v2, %v3660_v52  ;;  %v1734_v46 = vmul.f32 %v4425_v39, %v3839_v43  ;;  %v3855_v12 = vld [vmem:[%s4362_s3 + $0x4] ss:$0 sm:$0xff]  ;;  %v3895_v34 = vld [vmem:[#allocation2 + $0xe7] sm:$0xff] }
 0x1ad   : > { %v1574_v26 = vmul.f32 %v3278_v32, %v3767_v7  ;;  %v925_v4 = vadd.f32 %v909_v11, %v856_v14  ;;  %v1017_v62 = vmul.f32 %v3855_v12, %v3742_v0  ;;  %v1246_v63 = vadd.f32 %v1230_v29, %v1193_v60  ;;  %v3864_v32 = vld [vmem:[%s4362_s3 + $0x5] ss:$0 sm:$0xff]  ;;  %v3913_v57 = vld [vmem:[#allocation2 + $0xe8] sm:$0xff] }
 0x1ae   : > { %v1985_v41 = vmul.f32 %v1969_v42, %v1825_v1  ;;  %v1891_v47 = vadd.f32 %v1875_v15, %v3796_v33  ;;  %v1537_v52 = vadd.f32 %v1521_v20, %v1482_v44  ;;  %v1826_v35 = vadd.f32 %v3426_v16, %v1802_v54  ;;  %v3922_v60 = vld [vmem:[%s4362_s3 + $0x9] ss:$0 sm:$0xff] }
 0x1af   : > { %v1697_v39 = vadd.f32 %v1681_v24, %v1642_v9  ;;  %v978_v56 = vadd.f32 %v962_v10, %v925_v4  ;;  %v1070_v36 = vmul.f32 %v3864_v32, %v3755_v22  ;;  %v1299_v19 = vadd.f32 %v1283_v53, %v1246_v63  ;;  %v3881_v24 = vld [vmem:[%s4362_s3 + $0x6] ss:$0 sm:$0xff]  ;;  %v3904_v53 = vld [vmem:[#allocation2 + $0x209] sm:$0xff] }
 0x1b0   : > { %v2702_v6 = vpop.eup %2701  ;;  %2577 = vmatprep.mubr.msk.f32.mxu0 %vm292_vm0, %v1985_v41  ;;  %v1907_v1 = vmul.f32 0.7978846, %v1891_v47  ;;  %v1627_v40 = vmul.f32 %v4419_v45, %v3777_v5  ;;  %v1361_v3 = vmul.f32 %v3874_v37, %v3695_v58  ;;  %v1123_v29 = vmul.f32 %v3881_v24, %v3760_v8  ;;  %v3888_v45 = vld [vmem:[%s4362_s3 + $0xd] ss:$0 sm:$0xff]  ;;  %v3927_v4 = vld [vmem:[#allocation2 + $0x20f] sm:$0xff] }
 0x1b1   : > { %v1938_v27 = vadd.f32 1.0, %v2702_v6  ;;  %v1033_v54 = vadd.f32 %v1017_v62, %v978_v56  ;;  %v1414_v20 = vmul.f32 %v3888_v45, %v3717_v25  ;;  %v3893_v58 = vadd.f32 %v3345_v30, %v1299_v19  ;;  %v3909_v30 = vld [vmem:[%s4362_s3 + $0x8] ss:$0 sm:$0xff]  ;;  %v3939_v47 = vld [vmem:[%s4362_s3 + $0x14] ss:$0 sm:$0xff] }
 0x1b2   : > { %2703 = vtanh.f32 %v1907_v1  ;;  %v1590_v55 = vadd.f32 %v1574_v26, %v1537_v52  ;;  %v1467_v44 = vmul.f32 %v3900_v23, %v3719_v38  ;;  %v1178_v25 = vmul.f32 %v3909_v30, %v3895_v34  ;;  %v3944_v52 = vld [vmem:[#allocation2 + $0xe9] sm:$0xff] }
 0x1b3   : > { %v1954_v9 = vmul.f32 0.5, %v1938_v27  ;;  %v1086_v14 = vadd.f32 %v1070_v36, %v1033_v54  ;;  %v1430_v11 = vadd.f32 %v1414_v20, %v1361_v3  ;;  %v1750_v42 = vadd.f32 %v1734_v46, %v1697_v39  ;;  %v3951_v1 = vld [vmem:[%s4362_s3 + $0xa] ss:$0 sm:$0xff]  ;;  %v3965_v20 = vld [vmem:[%s4362_s3 + $0x11] ss:$0 sm:$0xff] }
 0x1b4   : > { %v1787_v15 = vmul.f32 %v4426_v48, %v3904_v53  ;;  %v1844_v38 = vmul.f32 %v3893_v58, %v3893_v58  ;;  %v1231_v10 = vmul.f32 %v3922_v60, %v3913_v57  ;;  %v3932_v48 = vld [vmem:[%s4362_s3 + $0x10] ss:$0 sm:$0xff]  ;;  %v857_v39 = vmul.f32 %v3827_v51, %v3677_v59 }
 0x1b5   : > { %v1970_v26 = vmul.f32 %v1954_v9, %v3738_v61  ;;  %v1139_v62 = vadd.f32 %v1123_v29, %v1086_v14  ;;  %v1483_v46 = vadd.f32 %v1467_v44, %v1430_v11  ;;  %v1522_v41 = vmul.f32 %v3932_v48, %v3805_v21  ;;  %v3976_v44 = vld [vmem:[#allocation2 + $0x211] sm:$0xff] }
 0x1b6   : > { %v1682_v61 = vmul.f32 %v3939_v47, %v3927_v4  ;;  %v1860_v63 = vmul.f32 %v1844_v38, %v3893_v58  ;;  %v1643_v36 = vadd.f32 %v1627_v40, %v1590_v55  ;;  %v1284_v19 = vmul.f32 %v3951_v1, %v3944_v52 }
 0x1b7   : > { %v1986_v56 = vmul.f32 %v1970_v26, %v1826_v35  ;;  %v1194_v6 = vadd.f32 %v1178_v25, %v1139_v62  ;;  %v910_v27 = vmul.f32 %v3834_v31, %v3691_v28  ;;  %v963_v54 = vmul.f32 %v3844_v2, %v3703_v17  ;;  %v3960_v35 = vld [vmem:[#allocation2 + $0x210] sm:$0xff] }
 0x1b8   : > { %v1876_v3 = vmul.f32 0.044715, %v1860_v63  ;;  %v1803_v59 = vadd.f32 %v1787_v15, %v1750_v42  ;;  %v1538_v29 = vadd.f32 %v1522_v41, %v1483_v46  ;;  %v1575_v55 = vmul.f32 %v3965_v20, %v3839_v43  ;;  %v3972_v28 = vld [vmem:[%s4362_s3 + $0x15] ss:$0 sm:$0xff]  ;;  %v3984_v42 = vld [vmem:[%s4362_s3 + $0x16] ss:$0 sm:$0xff] }
 0x1b9   : > { %2578 = vmatmul.mubr.msk.f32.gmra.mrb[18].mxu0 %vm292_vm0, %v1986_v56  ;;  %v1247_v40 = vadd.f32 %v1231_v10, %v1194_v6  ;;  %v1735_v17 = vmul.f32 %v3972_v28, %v3960_v35  ;;  %v926_v14 = vadd.f32 %v910_v27, %v857_v39  ;;  %v1018_v25 = vmul.f32 %v3855_v12, %v3803_v49  ;;  %v3997_v39 = vld [vmem:[%s4363_s4] ss:$0 sm:$0xff] }
 0x1ba   : > { %v1892_v9 = vadd.f32 %v1876_v3, %v3893_v58  ;;  %v1698_v11 = vadd.f32 %v1682_v61, %v1643_v36  ;;  %v1788_v15 = vmul.f32 %v3984_v42, %v3976_v44  ;;  %v1362_v10 = vmul.f32 %v3874_v37, %v3747_v13  ;;  %v4005_v13 = vld [vmem:[%s4362_s3 + $0x12] ss:$0 sm:$0xff] }
 0x1bb   : > { %v1300_v38 = vadd.f32 %v1284_v19, %v1247_v40  ;;  %v979_v46 = vadd.f32 %v963_v54, %v926_v14  ;;  %v1071_v41 = vmul.f32 %v3864_v32, %v3811_v18  ;;  %v1415_v61 = vmul.f32 %v3888_v45, %v3767_v7  ;;  %v4012_v54 = vld [vmem:[#allocation2 + $0x227] sm:$0xff] }
 0x1bc   : > { %v2704_v26 = vpop.eup %2703  ;;  %v1908_v62 = vmul.f32 0.7978846, %v1892_v9  ;;  %v1591_v36 = vadd.f32 %v1575_v55, %v1538_v29  ;;  %v1628_v6 = vmul.f32 %v4005_v13, %v3904_v53  ;;  %v1827_v7 = vadd.f32 %v3426_v16, %v1803_v59  ;;  %v4016_v29 = vld [vmem:[#allocation2 + $0xef] sm:$0xff] }
 0x1bd   : > { %v1939_v63 = vadd.f32 1.0, %v2704_v26  ;;  %v4000_v56 = vadd.f32 %v3997_v39, %v1300_v38  ;;  %v1034_v19 = vadd.f32 %v1018_v25, %v979_v46  ;;  %v1124_v3 = vmul.f32 %v3881_v24, %v3820_v50  ;;  %4430 = vst [vmem:[#allocation13_spill] sm:$0xff] %v4016_v29  ;;  %v4024_v26 = vld [vmem:[#allocation2 + $0xf0] sm:$0xff] }
 0x1be   : > { %2705 = vtanh.f32 %v1908_v62  ;;  %v1431_v55 = vadd.f32 %v1415_v61, %v1362_v10  ;;  %v1468_v9 = vmul.f32 %v3900_v23, %v3777_v5  ;;  %v1751_v14 = vadd.f32 %v1735_v17, %v1698_v11 }
 0x1bf   : > { %v1955_v27 = vmul.f32 0.5, %v1939_v63  ;;  %v1845_v40 = vmul.f32 %v4000_v56, %v4000_v56  ;;  %v1683_v59 = vmul.f32 %v3939_v47, %v4012_v54  ;;  %v1087_v25 = vadd.f32 %v1071_v41, %v1034_v19 }
 0x1c0   : > { %v1179_v38 = vmul.f32 %v3909_v30, %v4016_v29  ;;  %v1644_v46 = vadd.f32 %v1628_v6, %v1591_v36  ;;  %v1232_v10 = vmul.f32 %v3922_v60, %v4024_v26  ;;  %v1523_v5 = vmul.f32 %v3932_v48, %v3927_v4  ;;  %v4036_v29 = vld [vmem:[#allocation2 + $0xf1] sm:$0xff]  ;;  %v4040_v6 = vld [vmem:[#allocation2 + $0x228] sm:$0xff] }
 0x1c1   : > { %v1971_v62 = vmul.f32 %v1955_v27, %v3796_v33  ;;  %v1861_v63 = vmul.f32 %v1845_v40, %v4000_v56  ;;  %v1140_v61 = vadd.f32 %v1124_v3, %v1087_v25  ;;  %v858_v17 = vmul.f32 %v3827_v51, %v3742_v0 }
 0x1c2   : > { %v911_v11 = vmul.f32 %v3834_v31, %v3755_v22  ;;  %v1484_v33 = vadd.f32 %v1468_v9, %v1431_v55  ;;  %v964_v36 = vmul.f32 %v3844_v2, %v3760_v8  ;;  %v1285_v27 = vmul.f32 %v3951_v1, %v4036_v29 }
 0x1c3   : > { %v1987_v41 = vmul.f32 %v1971_v62, %v1827_v7  ;;  %v1877_v19 = vmul.f32 0.044715, %v1861_v63  ;;  %v1195_v3 = vadd.f32 %v1179_v38, %v1140_v61  ;;  %v1019_v0 = vmul.f32 %v3855_v12, %v3895_v34 }
 0x1c4   : > { %v927_v40 = vadd.f32 %v911_v11, %v858_v17  ;;  %v1804_v22 = vadd.f32 %v1788_v15, %v1751_v14  ;;  %v1736_v7 = vmul.f32 %v3972_v28, %v4040_v6  ;;  %v1576_v8 = vmul.f32 %v3965_v20, %v3960_v35 }
 0x1c5   : > { %2580 = vmatprep.mubr.msk.f32.mxu0 %vm292_vm0, %v1987_v41  ;;  %v1893_v55 = vadd.f32 %v1877_v19, %v4000_v56  ;;  %v1248_v9 = vadd.f32 %v1232_v10, %v1195_v3  ;;  %v1072_v38 = vmul.f32 %v3864_v32, %v3913_v57  ;;  %v1539_v63 = vadd.f32 %v1523_v5, %v1484_v33  ;;  %v4062_v3 = vld [vmem:[#allocation2 + $0x107] sm:$0xff] }
 0x1c6   : > { %v980_v25 = vadd.f32 %v964_v36, %v927_v40  ;;  %v1363_v61 = vmul.f32 %v3874_v37, %v3805_v21  ;;  %v1416_v15 = vmul.f32 %v3888_v45, %v3839_v43  ;;  %v1699_v17 = vadd.f32 %v1683_v59, %v1644_v46  ;;  %v4060_v36 = vld [vmem:[#allocation2 + $0x229] sm:$0xff] }
 0x1c7   : > { %v1909_v62 = vmul.f32 0.7978846, %v1893_v55  ;;  %v1301_v11 = vadd.f32 %v1285_v27, %v1248_v9  ;;  %v1125_v10 = vmul.f32 %v3881_v24, %v3944_v52  ;;  %v1469_v21 = vmul.f32 %v3900_v23, %v3904_v53  ;;  %v4076_v9 = vld [vmem:[#allocation2 + $0x108] sm:$0xff] }
 0x1c8   : > { %v2706_v14 = vpop.eup %2705  ;;  %v1035_v41 = vadd.f32 %v1019_v0, %v980_v25  ;;  %v1432_v5 = vadd.f32 %v1416_v15, %v1363_v61  ;;  %v1789_v43 = vmul.f32 %v3984_v42, %v4060_v36  ;;  %v1180_v33 = vmul.f32 %v3909_v30, %v4062_v3  ;;  %v4083_v15 = vld [vmem:[#allocation2 + $0x109] sm:$0xff] }
 0x1c9   : > { %v1940_v19 = vadd.f32 1.0, %v2706_v14  ;;  %2707 = vtanh.f32 %v1909_v62  ;;  %v4069_v59 = vadd.f32 %v3997_v39, %v1301_v11  ;;  %v1828_v27 = vadd.f32 %v3426_v16, %v1804_v22 }
 0x1ca   : > { %v1088_v46 = vadd.f32 %v1072_v38, %v1035_v41  ;;  %v1592_v0 = vadd.f32 %v1576_v8, %v1539_v63  ;;  %v1629_v55 = vmul.f32 %v4005_v13, %v3976_v44  ;;  %v1752_v53 = vadd.f32 %v1736_v7, %v1699_v17  ;;  %v4089_v63 = vld [vmem:[#allocation2 + $0x22f] sm:$0xff] }
 0x1cb   : > { %v1956_v40 = vmul.f32 0.5, %v1940_v19  ;;  %v1846_v25 = vmul.f32 %v4069_v59, %v4069_v59  ;;  %v1233_v38 = vmul.f32 %v3922_v60, %v4076_v9  ;;  %v1485_v16 = vadd.f32 %v1469_v21, %v1432_v5 }
 0x1cc   : > { %v1141_v62 = vadd.f32 %v1125_v10, %v1088_v46  ;;  %v1524_v22 = vmul.f32 %v3932_v48, %v4012_v54  ;;  %v859_v8 = vmul.f32 %v3827_v51, %v3803_v49  ;;  %v1286_v17 = vmul.f32 %v3951_v1, %v4083_v15  ;;  %v4100_v49 = vld [vmem:[#allocation2 + $0x230] sm:$0xff] }
 0x1cd   : > { %v1972_v61 = vmul.f32 %v1956_v40, %v3893_v58  ;;  %v1862_v7 = vmul.f32 %v1846_v25, %v4069_v59  ;;  %v912_v58 = vmul.f32 %v3834_v31, %v3811_v18  ;;  %v1645_v41 = vadd.f32 %v1629_v55, %v1592_v0 }
 0x1ce   : > { %v1196_v14 = vadd.f32 %v1180_v33, %v1141_v62  ;;  %v1684_v10 = vmul.f32 %v3939_v47, %v4089_v63  ;;  %v965_v19 = vmul.f32 %v3844_v2, %v3820_v50  ;;  %v4431_v33 = vld [vmem:[#allocation13_spill] sm:$0xff]  ;;  %v1805_v25 = vadd.f32 %v1789_v43, %v1752_v53 }
 0x1cf   : > { %v1988_v11 = vmul.f32 %v1972_v61, %v1828_v27  ;;  %v1878_v5 = vmul.f32 0.044715, %v1862_v7  ;;  %v928_v46 = vadd.f32 %v912_v58, %v859_v8  ;;  %v1020_v40 = vmul.f32 %v3855_v12, %v4431_v33  ;;  %v4121_v58 = vld [vmem:[#allocation2 + $0x10f] sm:$0xff] }
 0x1d0   : > { %v1249_v21 = vadd.f32 %v1233_v38, %v1196_v14  ;;  %v1737_v18 = vmul.f32 %v3972_v28, %v4100_v49  ;;  %v1540_v27 = vadd.f32 %v1524_v22, %v1485_v16  ;;  %v1577_v0 = vmul.f32 %v3965_v20, %v4040_v6 }
 0x1d1   : > { %2581 = vmatmul.mubr.msk.f32.gmra.mrb[20].mxu0 %vm292_vm0, %v1988_v11  ;;  %v1894_v50 = vadd.f32 %v1878_v5, %v4069_v59  ;;  %v981_v62 = vadd.f32 %v965_v19, %v928_v46  ;;  %v1073_v38 = vmul.f32 %v3864_v32, %v4024_v26  ;;  %v1700_v8 = vadd.f32 %v1684_v10, %v1645_v41  ;;  %v4126_v11 = vld [vmem:[%s4363_s4 + $0x1] ss:$0 sm:$0xff]  ;;  %v4133_v5 = vld [vmem:[#allocation2 + $0x231] sm:$0xff] }
 0x1d2   : > { %v1302_v55 = vadd.f32 %v1286_v17, %v1249_v21  ;;  %v1126_v7 = vmul.f32 %v3881_v24, %v4036_v29  ;;  %v1364_v43 = vmul.f32 %v3874_v37, %v3927_v4  ;;  %v1417_v53 = vmul.f32 %v3888_v45, %v3960_v35 }
 0x1d3   : > { %v2708_v61 = vpop.eup %2707  ;;  %v1910_v22 = vmul.f32 0.7978846, %v1894_v50  ;;  %v1036_v17 = vadd.f32 %v1020_v40, %v981_v62  ;;  %v1829_v41 = vadd.f32 %v4126_v11, %v1805_v25  ;;  %v1593_v10 = vadd.f32 %v1577_v0, %v1540_v27  ;;  %v4139_v25 = vld [vmem:[#allocation2 + $0x110] sm:$0xff]  ;;  %v4144_v62 = vld [vmem:[#allocation2 + $0x247] sm:$0xff] }
 0x1d4   : > { %v1941_v16 = vadd.f32 1.0, %v2708_v61  ;;  %v4119_v14 = vadd.f32 %v3997_v39, %v1302_v55  ;;  %v1630_v4 = vmul.f32 %v4005_v13, %v4060_v36  ;;  %v1181_v35 = vmul.f32 %v3909_v30, %v4121_v58 }
 0x1d5   : > { %2709 = vtanh.f32 %v1910_v22  ;;  %v1089_v46 = vadd.f32 %v1073_v38, %v1036_v17  ;;  %v1753_v40 = vadd.f32 %v1737_v18, %v1700_v8  ;;  %v1790_v50 = vmul.f32 %v3984_v42, %v4133_v5  ;;  %v4149_v18 = vld [vmem:[#allocation2 + $0x111] sm:$0xff] }
 0x1d6   : > { %v1957_v19 = vmul.f32 0.5, %v1941_v16  ;;  %v1847_v21 = vmul.f32 %v4119_v14, %v4119_v14  ;;  %v1433_v27 = vadd.f32 %v1417_v53, %v1364_v43  ;;  %v1470_v0 = vmul.f32 %v3900_v23, %v3976_v44 }
 0x1d7   : > { %v1142_v16 = vadd.f32 %v1126_v7, %v1089_v46  ;;  %v1234_v38 = vmul.f32 %v3922_v60, %v4139_v25  ;;  %v1646_v8 = vadd.f32 %v1630_v4, %v1593_v10  ;;  %v1685_v22 = vmul.f32 %v3939_v47, %v4144_v62  ;;  %v4164_v46 = vld [vmem:[#allocation2 + $0x248] sm:$0xff] }
 0x1d8   : > { %v1973_v55 = vmul.f32 %v1957_v19, %v4000_v56  ;;  %v1863_v61 = vmul.f32 %v1847_v21, %v4119_v14  ;;  %v1287_v43 = vmul.f32 %v3951_v1, %v4149_v18  ;;  %v860_v44 = vmul.f32 %v3827_v51, %v3895_v34 }
 0x1d9   : > { %v1197_v17 = vadd.f32 %v1181_v35, %v1142_v16  ;;  %v913_v7 = vmul.f32 %v3834_v31, %v3913_v57  ;;  %v1806_v19 = vadd.f32 %v1790_v50, %v1753_v40  ;;  %v1486_v21 = vadd.f32 %v1470_v0, %v1433_v27  ;;  %v4171_v50 = vld [vmem:[#allocation2 + $0x249] sm:$0xff] }
 0x1da   : > { %v1989_v56 = vmul.f32 %v1973_v55, %v1829_v41  ;;  %v1879_v53 = vmul.f32 0.044715, %v1863_v61  ;;  %v1525_v10 = vmul.f32 %v3932_v48, %v4089_v63  ;;  %v966_v4 = vmul.f32 %v3844_v2, %v3944_v52 }
 0x1db   : > { %v1250_v41 = vadd.f32 %v1234_v38, %v1197_v17  ;;  %v929_v55 = vadd.f32 %v913_v7, %v860_v44  ;;  %v1021_v35 = vmul.f32 %v3855_v12, %v4062_v3  ;;  %v1701_v57 = vadd.f32 %v1685_v22, %v1646_v8  ;;  %v1160_v8 = vld [vmem:[#allocation2 + $0x127] sm:$0xff] }
 0x1dc   : > { %2583 = vmatprep.mubr.msk.f32.mxu0 %vm292_vm0, %v1989_v56  ;;  %v1895_v34 = vadd.f32 %v1879_v53, %v4119_v14  ;;  %v1738_v40 = vmul.f32 %v3972_v28, %v4164_v46  ;;  %v1074_v61 = vmul.f32 %v3864_v32, %v4076_v9  ;;  %v1830_v16 = vadd.f32 %v4126_v11, %v1806_v19  ;;  %v1214_v9 = vld [vmem:[#allocation2 + $0x128] sm:$0xff] }
 0x1dd   : > { %v1303_v0 = vadd.f32 %v1287_v43, %v1250_v41  ;;  %v982_v52 = vadd.f32 %v966_v4, %v929_v55  ;;  %v1791_v38 = vmul.f32 %v3984_v42, %v4171_v50  ;;  %v1541_v44 = vadd.f32 %v1525_v10, %v1486_v21  ;;  %v1267_v17 = vld [vmem:[#allocation2 + $0x129] sm:$0xff] }
 0x1de   : > { %v1911_v27 = vmul.f32 0.7978846, %v1895_v34  ;;  %v1578_v3 = vmul.f32 %v3965_v20, %v4100_v49  ;;  %v1127_v53 = vmul.f32 %v3881_v24, %v4083_v15  ;;  %v1754_v19 = vadd.f32 %v1738_v40, %v1701_v57 }
 0x1df   : > { %v2710_v22 = vpop.eup %2709  ;;  %v4181_v56 = vadd.f32 %v3997_v39, %v1303_v0  ;;  %v1037_v43 = vadd.f32 %v1021_v35, %v982_v52  ;;  %v1365_v21 = vmul.f32 %v3874_v37, %v4012_v54  ;;  %v1418_v10 = vmul.f32 %v3888_v45, %v4040_v6 }
 0x1e0   : > { %2711 = vtanh.f32 %v1911_v27  ;;  %v1942_v7 = vadd.f32 1.0, %v2710_v22  ;;  %v1631_v4 = vmul.f32 %v4005_v13, %v4133_v5  ;;  %v1182_v55 = vmul.f32 %v3909_v30, %v1160_v8 }
 0x1e1   : > { %v1848_v34 = vmul.f32 %v4181_v56, %v4181_v56  ;;  %v1090_v41 = vadd.f32 %v1074_v61, %v1037_v43  ;;  %v1594_v35 = vadd.f32 %v1578_v3, %v1541_v44  ;;  %v1235_v27 = vmul.f32 %v3922_v60, %v1214_v9  ;;  %v1664_v3 = vld [vmem:[#allocation2 + $0x24f] sm:$0xff] }
 0x1e2   : > { %v1958_v15 = vmul.f32 0.5, %v1942_v7  ;;  %v1288_v57 = vmul.f32 %v3951_v1, %v1267_v17  ;;  %v861_v6 = vmul.f32 %v3827_v51, %v4431_v33  ;;  %v914_v0 = vmul.f32 %v3834_v31, %v4024_v26  ;;  %v1718_v26 = vld [vmem:[#allocation2 + $0x250] sm:$0xff] }
 0x1e3   : > { %v1864_v54 = vmul.f32 %v1848_v34, %v4181_v56  ;;  %v1143_v40 = vadd.f32 %v1127_v53, %v1090_v41  ;;  %v1434_v61 = vadd.f32 %v1418_v10, %v1365_v21  ;;  %v1471_v8 = vmul.f32 %v3900_v23, %v4060_v36 }
 0x1e4   : > { %v1974_v52 = vmul.f32 %v1958_v15, %v4069_v59  ;;  %v967_v44 = vmul.f32 %v3844_v2, %v4036_v29  ;;  %v930_v9 = vadd.f32 %v914_v0, %v861_v6  ;;  %v1022_v53 = vmul.f32 %v3855_v12, %v4121_v58  ;;  %v1161_v58 = vld [vmem:[#allocation2 + $0x12f] sm:$0xff] }
 0x1e5   : > { %v1880_v22 = vmul.f32 0.044715, %v1864_v54  ;;  %v1198_v43 = vadd.f32 %v1182_v55, %v1143_v40  ;;  %v1807_v33 = vadd.f32 %v1791_v38, %v1754_v19  ;;  %v1686_v31 = vmul.f32 %v3939_v47, %v1664_v3  ;;  %v1268_v54 = vld [vmem:[#allocation2 + $0x131] sm:$0xff] }
 0x1e6   : > { %v1990_v51 = vmul.f32 %v1974_v52, %v1830_v16  ;;  %v983_v7 = vadd.f32 %v967_v44, %v930_v9  ;;  %v1075_v36 = vmul.f32 %v3864_v32, %v4139_v25  ;;  %v1647_v2 = vadd.f32 %v1631_v4, %v1594_v35  ;;  %v1215_v25 = vld [vmem:[#allocation2 + $0x130] sm:$0xff] }
 0x1e7   : > { %v1896_v59 = vadd.f32 %v1880_v22, %v4181_v56  ;;  %v1251_v17 = vadd.f32 %v1235_v27, %v1198_v43  ;;  %v1739_v29 = vmul.f32 %v3972_v28, %v1718_v26  ;;  %v1487_v21 = vadd.f32 %v1471_v8, %v1434_v61  ;;  %v1771_v40 = vld [vmem:[#allocation2 + $0x251] sm:$0xff]  ;;  %v1665_v43 = vld [vmem:[#allocation2 + $0x267] sm:$0xff] }
 0x1e8   : > { %2584 = vmatmul.mubr.msk.f32.gmra.mrb[22].mxu0 %vm292_vm0, %v1990_v51  ;;  %v1526_v12 = vmul.f32 %v3932_v48, %v4144_v62  ;;  %v1038_v10 = vadd.f32 %v1022_v53, %v983_v7  ;;  %v1128_v34 = vmul.f32 %v3881_v24, %v4149_v18  ;;  %v1831_v41 = vadd.f32 %v4126_v11, %v1807_v33 }
 0x1e9   : > { %v1912_v38 = vmul.f32 0.7978846, %v1896_v59  ;;  %v1304_v19 = vadd.f32 %v1288_v57, %v1251_v17  ;;  %v1366_v4 = vmul.f32 %v3874_v37, %v4089_v63  ;;  %v1419_v55 = vmul.f32 %v3888_v45, %v4100_v49  ;;  %v1719_v17 = vld [vmem:[#allocation2 + $0x268] sm:$0xff] }
 0x1ea   : > { %v2712_v16 = vpop.eup %2711  ;;  %v1091_v15 = vadd.f32 %v1075_v36, %v1038_v10  ;;  %v1183_v35 = vmul.f32 %v3909_v30, %v1161_v58  ;;  %v1702_v57 = vadd.f32 %v1686_v31, %v1647_v2  ;;  %v1542_v24 = vadd.f32 %v1526_v12, %v1487_v21 }
 0x1eb   : > { %v1943_v32 = vadd.f32 1.0, %v2712_v16  ;;  %2713 = vtanh.f32 %v1912_v38  ;;  %v4224_v62 = vadd.f32 %v3997_v39, %v1304_v19  ;;  %v1579_v18 = vmul.f32 %v3965_v20, %v4164_v46  ;;  %v1772_v16 = vld [vmem:[#allocation2 + $0x269] sm:$0xff] }
 0x1ec   : > { %v1144_v63 = vadd.f32 %v1128_v34, %v1091_v15  ;;  %v1236_v45 = vmul.f32 %v3922_v60, %v1215_v25  ;;  %v1435_v6 = vadd.f32 %v1419_v55, %v1366_v4  ;;  %v1472_v30 = vmul.f32 %v3900_v23, %v4133_v5  ;;  %v1720_v15 = vld [vmem:[#allocation2 + $0x270] sm:$0xff] }
 0x1ed   : > { %v1959_v27 = vmul.f32 0.5, %v1943_v32  ;;  %v1849_v37 = vmul.f32 %v4224_v62, %v4224_v62  ;;  %v1792_v0 = vmul.f32 %v3984_v42, %v1771_v40  ;;  %v1289_v46 = vmul.f32 %v3951_v1, %v1268_v54 }
 0x1ee   : > { %v1199_v61 = vadd.f32 %v1183_v35, %v1144_v63  ;;  %v1755_v44 = vadd.f32 %v1739_v29, %v1702_v57  ;;  %v1595_v22 = vadd.f32 %v1579_v18, %v1542_v24  ;;  %v1632_v60 = vmul.f32 %v4005_v13, %v4171_v50  ;;  %v1773_v18 = vld [vmem:[#allocation2 + $0x271] sm:$0xff] }
 0x1ef   : > { %v1975_v49 = vmul.f32 %v1959_v27, %v4119_v14  ;;  %v1865_v52 = vmul.f32 %v1849_v37, %v4224_v62  ;;  %v1488_v53 = vadd.f32 %v1472_v30, %v1435_v6  ;;  %v1527_v23 = vmul.f32 %v3932_v48, %v1664_v3 }
 0x1f0   : > { %v1252_v9 = vadd.f32 %v1236_v45, %v1199_v61  ;;  %v1808_v33 = vadd.f32 %v1792_v0, %v1755_v44  ;;  %v1648_v31 = vadd.f32 %v1632_v60, %v1595_v22  ;;  %v1687_v1 = vmul.f32 %v3939_v47, %v1665_v43 }
 0x1f1   : > { %v1991_v8 = vmul.f32 %v1975_v49, %v1831_v41  ;;  %v1881_v14 = vmul.f32 0.044715, %v1865_v52  ;;  %v1543_v2 = vadd.f32 %v1527_v23, %v1488_v53  ;;  %v1580_v29 = vmul.f32 %v3965_v20, %v1718_v26 }
 0x1f2   : > { %v1305_v51 = vadd.f32 %v1289_v46, %v1252_v9  ;;  %v1832_v48 = vadd.f32 %v4126_v11, %v1808_v33  ;;  %v1703_v12 = vadd.f32 %v1687_v1, %v1648_v31  ;;  %v1740_v58 = vmul.f32 %v3972_v28, %v1719_v17 }
 0x1f3   : > { %2586 = vmatprep.mubr.msk.f32.mxu0 %vm292_vm0, %v1991_v8  ;;  %v1897_v5 = vadd.f32 %v1881_v14, %v4224_v62  ;;  %v1596_v10 = vadd.f32 %v1580_v29, %v1543_v2  ;;  %v1633_v34 = vmul.f32 %v4005_v13, %v1771_v40  ;;  %v1793_v20 = vmul.f32 %v3984_v42, %v1772_v16 }
 0x1f4   : > { %v1328_v50 = vadd.f32 %v3997_v39, %v1305_v51  ;;  %v1666_v39 = vld [vmem:[#allocation2 + $0x26f] sm:$0xff]  ;;  %v1756_v25 = vadd.f32 %v1740_v58, %v1703_v12  ;;  %v1741_v13 = vmul.f32 %v3972_v28, %v1720_v15  ;;  %v1794_v49 = vmul.f32 %v3984_v42, %v1773_v18  ;;  %v2402_v42 = vld [vmem:[%s4365_s6] ss:$0 sm:$0xff] }
 0x1f5   : > { %v2714_v59 = vpop.eup %2713  ;;  %v1913_v7 = vmul.f32 0.7978846, %v1897_v5  ;;  %v1649_v4 = vadd.f32 %v1633_v34, %v1596_v10  ;;  %v1688_v55 = vmul.f32 %v3939_v47, %v1666_v39 }
 0x1f6   : > { %v1944_v36 = vadd.f32 1.0, %v2714_v59  ;;  %v1850_v21 = vmul.f32 %v1328_v50, %v1328_v50  ;;  %v1809_v27 = vadd.f32 %v1793_v20, %v1756_v25 }
 0x1f7   : > { %2715 = vtanh.f32 %v1913_v7  ;;  %v1704_v24 = vadd.f32 %v1688_v55, %v1649_v4 }
 0x1f8   : > { %v1960_v3 = vmul.f32 0.5, %v1944_v36  ;;  %v1866_v38 = vmul.f32 %v1850_v21, %v1328_v50  ;;  %v1833_v54 = vadd.f32 %v4126_v11, %v1809_v27 }
 0x1f9   : > { %v1757_v45 = vadd.f32 %v1741_v13, %v1704_v24 }
 0x1fa   : > { %v1976_v19 = vmul.f32 %v1960_v3, %v4181_v56  ;;  %v1882_v41 = vmul.f32 0.044715, %v1866_v38 }
 0x1fb   : > { %v1810_v40 = vadd.f32 %v1794_v49, %v1757_v45 }
 0x1fc   : > { %v1992_v32 = vmul.f32 %v1976_v19, %v1832_v48  ;;  %v1898_v26 = vadd.f32 %v1882_v41, %v1328_v50 }
 0x1fd   : > { %v1834_v0 = vadd.f32 %v4126_v11, %v1810_v40 }
 0x1fe   : > { %2587 = vmatmul.mubr.msk.f32.gmra.mrb[24].mxu0 %vm292_vm0, %v1992_v32  ;;  %v1914_v35 = vmul.f32 0.7978846, %v1898_v26 }
 0x200   : > { %2717 = vtanh.f32 %v1914_v35 }
 0x201   : > { %v2716_v57 = vpop.eup %2715 }
 0x202   : > { %v1945_v56 = vadd.f32 1.0, %v2716_v57 }
 0x204   : > { %v1961_v37 = vmul.f32 0.5, %v1945_v56 }
 0x206   : > { %v1977_v63 = vmul.f32 %v1961_v37, %v4224_v62 }
 0x208   : > { %v1993_v47 = vmul.f32 %v1977_v63, %v1833_v54 }
 0x20a   : > { %2589 = vmatprep.mubr.msk.f32.mxu0 %vm292_vm0, %v1993_v47  ;;  %v2718_v6 = vpop.eup %2717 }
 0x20b   : > { %v1946_v30 = vadd.f32 1.0, %v2718_v6 }
 0x20d   : > { %v1962_v28 = vmul.f32 0.5, %v1946_v30 }
 0x20f   : > { %v1978_v52 = vmul.f32 %v1962_v28, %v1328_v50 }
 0x211   : > { %v1994_v61 = vmul.f32 %v1978_v52, %v1834_v0 }
 0x213   : > { %2590 = vmatmul.mubr.msk.f32.gmra.mrb[26].mxu0 %vm292_vm0, %v1994_v61 }
 0x251   : > { %v2570_v62 = vpop.f32.mrb[12].mxu0 }
 0x252   : > { %v2126_v46 = vadd.f32 %v2570_v62, %v2402_v42  ;;  %v2120_v8 = vpop.f32.mrb[13].mxu0 }
 0x253   : > { %v2121_v44 = vadd.f32 %v2402_v42, %v2120_v8 }
 0x254   : > { %2200 = vst.msk [vmem:[%s3171_s23 + $0x8] sm:$0xff] %vm365_vm1, %v2126_v46 }
 0x255   : > { %2199 = vst.msk [vmem:[%s3171_s23] sm:$0xff] %vm365_vm1, %v2121_v44 }
 0x260   : > { %v2573_v11 = vpop.f32.mrb[14].mxu0 }
 0x261   : > { %v2136_v22 = vadd.f32 %v2573_v11, %v2402_v42  ;;  %v2130_v60 = vpop.f32.mrb[15].mxu0 }
 0x262   : > { %v2131_v43 = vadd.f32 %v2402_v42, %v2130_v60 }
 0x263   : > { %2202 = vst.msk [vmem:[%s3171_s23 + $0x18] sm:$0xff] %vm365_vm1, %v2136_v22 }
 0x264   : > { %2201 = vst.msk [vmem:[%s3171_s23 + $0x10] sm:$0xff] %vm365_vm1, %v2131_v43 }
 0x277   : > { %v2576_v14 = vpop.f32.mrb[16].mxu0 }
 0x278   : > { %v2146_v9 = vadd.f32 %v2576_v14, %v2402_v42  ;;  %v2140_v53 = vpop.f32.mrb[17].mxu0 }
 0x279   : > { %v2141_v23 = vadd.f32 %v2402_v42, %v2140_v53 }
 0x27a   : > { %2204 = vst.msk [vmem:[%s3171_s23 + $0x28] sm:$0xff] %vm365_vm1, %v2146_v9 }
 0x27b   : > { %2203 = vst.msk [vmem:[%s3171_s23 + $0x20] sm:$0xff] %vm365_vm1, %v2141_v23 }
 0x28c   : > { %v2579_v5 = vpop.f32.mrb[18].mxu0 }
 0x28d   : > { %v2156_v51 = vadd.f32 %v2579_v5, %v2402_v42  ;;  %v2150_v33 = vpop.f32.mrb[19].mxu0 }
 0x28e   : > { %v2151_v31 = vadd.f32 %v2402_v42, %v2150_v33 }
 0x28f   : > { %2206 = vst.msk [vmem:[%s3171_s23 + $0x38] sm:$0xff] %vm365_vm1, %v2156_v51 }
 0x290   : > { %2205 = vst.msk [vmem:[%s3171_s23 + $0x30] sm:$0xff] %vm365_vm1, %v2151_v31 }
 0x2a4   : > { %v2582_v1 = vpop.f32.mrb[20].mxu0 }
 0x2a5   : > { %v2166_v59 = vadd.f32 %v2582_v1, %v2402_v42  ;;  %v2160_v17 = vpop.f32.mrb[21].mxu0 }
 0x2a6   : > { %v2161_v7 = vadd.f32 %v2402_v42, %v2160_v17 }
 0x2a7   : > { %2208 = vst.msk [vmem:[%s3171_s23 + $0x48] sm:$0xff] %vm365_vm1, %v2166_v59 }
 0x2a8   : > { %2207 = vst.msk [vmem:[%s3171_s23 + $0x40] sm:$0xff] %vm365_vm1, %v2161_v7 }
 0x2bb   : > { %v2585_v50 = vpop.f32.mrb[22].mxu0 }
 0x2bc   : > { %v2176_v36 = vadd.f32 %v2585_v50, %v2402_v42  ;;  %v2170_v2 = vpop.f32.mrb[23].mxu0 }
 0x2bd   : > { %v2171_v29 = vadd.f32 %v2402_v42, %v2170_v2 }
 0x2be   : > { %2210 = vst.msk [vmem:[%s3171_s23 + $0x58] sm:$0xff] %vm365_vm1, %v2176_v36 }
 0x2bf   : > { %2209 = vst.msk [vmem:[%s3171_s23 + $0x50] sm:$0xff] %vm365_vm1, %v2171_v29 }
 0x2d1   : > { %v2588_v21 = vpop.f32.mrb[24].mxu0 }
 0x2d2   : > { %v2186_v48 = vadd.f32 %v2588_v21, %v2402_v42  ;;  %v2180_v3 = vpop.f32.mrb[25].mxu0 }
 0x2d3   : > { %v2181_v12 = vadd.f32 %v2402_v42, %v2180_v3 }
 0x2d4   : > { %2212 = vst.msk [vmem:[%s3171_s23 + $0x68] sm:$0xff] %vm365_vm1, %v2186_v48 }
 0x2d5   : > { %2211 = vst.msk [vmem:[%s3171_s23 + $0x60] sm:$0xff] %vm365_vm1, %v2181_v12 }
 0x2e6   : > { %v2591_v58 = vpop.f32.mrb[26].mxu0 }
 0x2e7   : > { %v2196_v16 = vadd.f32 %v2591_v58, %v2402_v42  ;;  %v2190_v38 = vpop.f32.mrb[27].mxu0 }
 0x2e8   : > { %v2191_v19 = vadd.f32 %v2402_v42, %v2190_v38 }
 0x2e9   : > { %2214 = vst.msk [vmem:[%s3171_s23 + $0x78] sm:$0xff] %vm365_vm1, %v2196_v16 }
 0x2ea   : > { %2213 = vst.msk [vmem:[%s3171_s23 + $0x70] sm:$0xff] %vm365_vm1, %v2191_v19 }
 0x2eb   : > { %2752 = shalt.err (!%p2749_p9)
}
 0x2ec   : > { %s2753_s23 = scalar_lea.hbm %s4297_s18, 2048  ;;  %s2757_s17 = scalar_lea.hbm %s4366_s7, 8192 }
 0x2ed   : > { %p2754_p10 = scmp.ne.s32.totalorder %s4297_s18, %s2753_s23  ;;  %p2758_p13 = scmp.lt.u32.totalorder %s4297_s18, %s4366_s7 }
 0x2ee   : > { %p2759_p0 = scmp.lt.u32.totalorder %s2757_s17, %s2753_s23  ;;  %p2761_p2 = scmp.lt.u32.totalorder %s2753_s23, %s4297_s18 }
 0x2ef   : > { %p2755_p11 = pnand %p2754_p10, %p2932_p3 }
 0x2f0   : > { %p2760_p1 = por %p2759_p0, %p2758_p13 }
 0x2f1   : > { %p2756_p12 = pneg %p2755_p11 }
 0x2f2   : > { %p2762_p4 = por %p2761_p2, %p2760_p1 }
 0x2f4   : > { %p2763_p5 = pnand %p2762_p4, %p2756_p12 }
 0x2f6   : > { %2766 = shalt.err (!%p2763_p5)
}
 0x2f7   : > { %s2839_s20 = smov 128   ;;  %s2840_s22 = smov 8  }
 0x2f8   : > { %2611 = dma.vmem_to_hbm [thread:$0]  (%p2932_p3), %s4299_s0, 2048, %s4297_s18, %s4307_s28, %s2839_s20, %s2839_s20, %s2840_s22  }
 0x2f9 PF: > { %p2617_p6 = scmp.ge.s32.totalorder %s2833_s8, 2  ;;  %s2247_s21 = sand.u32 1, %s2805_s24  }
 0x2fa   : > { %s2248_s9 = scalar_lea.sflag [#allocation4], %s2247_s21 }
 0x2fb   : > { %p2614_p7 = pnand %p2617_p6, %p2941_p8 }
 0x2fd   : > { %2800 = dma.done.wait (!%p2614_p7), %s2248_s9, 2048  }
 0x2fe   : > { %2802 = vsyncadd (!%p2614_p7), %s2248_s9, 4294965248  ;;  %s20_s8 = sadd.s32 1, %s2833_s8   ;;  %s4433_s24 = smov %s2809_s25 }
 0x2ff   : > { %p17_p9 = scmp.ge.s32.totalorder %s20_s8, 6   ;;  %s4434_s25 = smov %s2813_s26 }
 0x300   : > { %s4435_s26 = smov %s2950_s19  ;;  %s4436_s27 = smov %s2825_s29 }
 0x301   : > { %s4437_s28 = smov %s2829_s30  ;;  %s4438_s29 = smov %s4441_s11 }
 0x302   : > { %s4439_s30 = smov %s4445_s12  ;;  %19 = sbr.rel (!%p17_p9) target bundleno = 7 (0x7), region = 106 }
 0x309   :  { %2253 = vsyncpa [#allocation4], 1 }
 0x30a   :  { %2255 = vsyncpa [#allocation4 + $0x1], 1 }

</bundles_post_ra>
